<compile_context>
chip_gen: v6e
topology: v6e:2x2x1
jax: 0.10.0
libtpu: 0.0.40
codegen_flags: <defaults>
</compile_context>

<pallas_src>
import functools
import math

import jax
import jax.numpy as jnp
from jax.experimental import pallas as pl
from jax.experimental.pallas import tpu as pltpu

SQRT2 = math.sqrt(2.0)
LRELU_SLOPE = 0.2


# ----------------------------------------------------------------------------
# Pallas kernel: fused Fourier mapping + chain of modulated 1x1 convs + ToRGB
# ----------------------------------------------------------------------------
def _lrelu(x):
    # leaky_relu only: the fused_leaky_relu sqrt(2) gain has been folded into
    # the next layer's modulated weight on the glue side.
    return jnp.where(x >= 0, x, LRELU_SLOPE * x)


def _lrelu_scaled(x):
    # reference-path activation (original, unfolded semantics)
    return jnp.where(x >= 0, x, LRELU_SLOPE * x) * SQRT2


def inr_chain_kernel(g_ref, b2_ref, w1_ref, wc_ref, wrgb_ref,
                     b1_ref, bc_ref, brgb_ref, out_ref,
                     *, num_convs, in_dim, mxu_dtype):
    # g_ref    : (in_dim, TN)  raw grid coordinates for this point tile (f32)
    # b2_ref   : (F/2, in_dim) Fourier matrix, 2*pi pre-folded (f32)
    # w1_ref   : (C, F)        modulated+demodulated conv1 weight (bf16)
    # wc_ref   : (L, C, C)     body conv weights, sqrt(2) gain folded (bf16)
    # wrgb_ref : (3, C)        ToRGB weight, sqrt(2) gain folded (bf16)
    # b1_ref   : (C, 1)        conv1 FusedLeakyReLU bias (f32)
    # bc_ref   : (L, C, 1)     body conv FusedLeakyReLU biases (f32)
    # brgb_ref : (3, 1)        ToRGB bias (f32)
    # out_ref  : (3, TN)       lane-dense output block (f32)
    g = g_ref[...]                                       # (in_dim, TN) f32
    b2 = b2_ref[...]                                     # (F/2, in_dim) f32

    # Fourier projection via lane/sublane broadcasts (in_dim is tiny).
    proj = b2[:, 0:1] * g[0:1, :]                        # (F/2, TN)
    for d in range(1, in_dim):
        proj = proj + b2[:, d:d + 1] * g[d:d + 1, :]
    ff = jnp.concatenate([jnp.sin(proj), jnp.cos(proj)], axis=0)   # (F, TN) f32

    # conv1: (C, F) @ (F, TN) on the MXU, f32 accumulation.
    h = jnp.dot(w1_ref[...], ff.astype(mxu_dtype),
                preferred_element_type=jnp.float32)                # (C, TN)
    h = _lrelu(h + b1_ref[...])

    for l in range(num_convs):                                     # static unroll
        h = jnp.dot(wc_ref[l], h.astype(mxu_dtype),
                    preferred_element_type=jnp.float32)            # (C, TN)
        h = _lrelu(h + bc_ref[l])

    rgb = jnp.dot(wrgb_ref[...], h.astype(mxu_dtype),
                  preferred_element_type=jnp.float32)              # (3, TN)
    out_ref[...] = rgb + brgb_ref[...]          # skip connection is zeros -> no-op


def _pick_tile(n, tn):
    tn = min(tn, n)
    while tn > 0 and (n % tn != 0 or tn % 128 != 0):
        tn -= 128
    if tn <= 0:
        raise ValueError(f"num_points={n} must be a multiple of 128")
    return tn


def styled_chain_pallas(grid_t, b2, w1, wc, wrgb, b1, bc, brgb, *, tn=512):
    """grid_t: (B,in_dim,N) f32; b2: (F/2,in_dim) f32; w1: (B,C,F);
    wc: (B,L,C,C); wrgb: (B,3,C); biases column vectors."""
    B, in_dim, N = grid_t.shape
    C, Fdim = w1.shape[1], w1.shape[2]
    L = wc.shape[1]
    tn = _pick_tile(N, tn)
    kernel = functools.partial(inr_chain_kernel, num_convs=L, in_dim=in_dim,
                               mxu_dtype=w1.dtype)
    return pl.pallas_call(
        kernel,
        out_shape=jax.ShapeDtypeStruct((B, 3, N), jnp.float32),
        grid=(B, N // tn),
        in_specs=[
            pl.BlockSpec((None, in_dim, tn), lambda b, n: (b, 0, n)),
            pl.BlockSpec((Fdim // 2, in_dim), lambda b, n: (0, 0)),
            pl.BlockSpec((None, C, Fdim), lambda b, n: (b, 0, 0)),
            pl.BlockSpec((None, L, C, C), lambda b, n: (b, 0, 0, 0)),
            pl.BlockSpec((None, 3, C), lambda b, n: (b, 0, 0)),
            pl.BlockSpec((C, 1), lambda b, n: (0, 0)),
            pl.BlockSpec((L, C, 1), lambda b, n: (0, 0, 0)),
            pl.BlockSpec((3, 1), lambda b, n: (0, 0)),
        ],
        out_specs=pl.BlockSpec((None, 3, tn), lambda b, n: (b, 0, n)),
        compiler_params=pltpu.CompilerParams(
            dimension_semantics=("parallel", "parallel")),
    )(grid_t, b2, w1, wc, wrgb, b1, bc, brgb)


# ----------------------------------------------------------------------------
# Plain-JAX glue: style MLP, Fourier mapping, weight modulation (StyleGAN2)
# ----------------------------------------------------------------------------
def pixel_norm(x):
    return x * jax.lax.rsqrt(jnp.mean(x * x, axis=1, keepdims=True) + 1e-8)


def equal_linear_fused_lrelu(x, w, b, lr_mul):
    scale = (1.0 / math.sqrt(w.shape[1])) * lr_mul
    t = x @ (w * scale).T + b * lr_mul
    return jnp.where(t >= 0, t, LRELU_SLOPE * t) * SQRT2


def equal_linear(x, w, b, lr_mul=1.0):
    scale = (1.0 / math.sqrt(w.shape[1])) * lr_mul
    return x @ (w * scale).T + b * lr_mul


def fourier_mapping(grid_flat, b_mat):
    # TODO(synk): exact FourierMapping from the dinr repo not provided; using
    # standard Gaussian Fourier features: [sin(2*pi*x@B), cos(2*pi*x@B)].
    proj = 2.0 * math.pi * (grid_flat @ b_mat)
    return jnp.concatenate([jnp.sin(proj), jnp.cos(proj)], axis=-1)


def modulated_weight(conv_w, mod_w, mod_b, latent, demodulate):
    """ModulatedConv2d (1x1) -> per-batch matmul weight as (B, out, in)."""
    style = equal_linear(latent, mod_w, mod_b)                     # (B, in)
    out_ch, in_ch = conv_w.shape
    conv_scale = 1.0 / math.sqrt(in_ch)                            # kernel size 1
    w = conv_scale * conv_w[None, :, :] * style[:, None, :]        # (B, out, in)
    if demodulate:
        demod = jax.lax.rsqrt(jnp.sum(w * w, axis=2) + 1e-8)       # (B, out)
        w = w * demod[:, :, None]
    return w                                                       # (B, out, in)


# ----------------------------------------------------------------------------
# Parameter construction (mirrors INRGenerator.__init__ shapes)
# ----------------------------------------------------------------------------
def init_params(key, *, style_dim, n_mlp, num_channels, num_layers, fourier_out,
                grid_dim, lr_mlp):
    num_convs = 2 * (num_layers // 2)
    keys = iter(jax.random.split(key, 8 + n_mlp + 2 * (num_convs + 2)))

    def nk():
        return next(keys)

    p = {"num_layers": num_layers, "lr_mlp": lr_mlp}
    p["style_mlp"] = [
        (jax.random.normal(nk(), (style_dim, style_dim)) / lr_mlp,
         jnp.zeros((style_dim,)))
        for _ in range(n_mlp)
    ]
    p["fourier_B"] = jax.random.normal(nk(), (grid_dim, fourier_out // 2))

    def styled_conv_params(in_ch, out_ch):
        return {
            "conv_w": jax.random.normal(nk(), (out_ch, in_ch)),
            "mod_w": jax.random.normal(nk(), (in_ch, style_dim)),
            "mod_b": jnp.ones((in_ch,)),           # EqualLinear bias_init=1
            "act_b": jnp.zeros((out_ch,)),         # FusedLeakyReLU bias
        }

    p["conv1"] = styled_conv_params(fourier_out, num_channels)
    p["convs"] = [styled_conv_params(num_channels, num_channels)
                  for _ in range(num_convs)]
    p["to_rgb"] = {
        "conv_w": jax.random.normal(nk(), (3, num_channels)),
        "mod_w": jax.random.normal(nk(), (num_channels, style_dim)),
        "mod_b": jnp.ones((num_channels,)),
        "bias": jnp.zeros((3,)),
    }
    return p


# ----------------------------------------------------------------------------
# Forward pass (single style, no truncation, skip_connections=False,
# coordinate_embedding=None, noise_injection=False)
# ----------------------------------------------------------------------------
def inr_generator_forward(grid, style_z, params, *, use_pallas=True, tn=512,
                          mxu_dtype=jnp.bfloat16):
    B, N, in_dim = grid.shape
    num_convs = len(params["convs"])
    n_latent = params["num_layers"] + 1

    # style network: PixelNorm + n_mlp EqualLinear(fused_lrelu)
    s = pixel_norm(style_z)
    for (w, b) in params["style_mlp"]:
        s = equal_linear_fused_lrelu(s, w, b, params["lr_mlp"])
    latent = jnp.repeat(s[:, None, :], n_latent, axis=1)          # (B, n_latent, D)

    # per-batch modulated weights (glue, tiny vs the per-point chain)
    c1 = params["conv1"]
    w1 = modulated_weight(c1["conv_w"], c1["mod_w"], c1["mod_b"],
                          latent[:, 0], demodulate=True)          # (B, C, F)
    wc = jnp.stack(
        [modulated_weight(cv["conv_w"], cv["mod_w"], cv["mod_b"],
                          latent[:, 1 + l], demodulate=True)
         for l, cv in enumerate(params["convs"])], axis=1)        # (B, L, C, C)
    rgbp = params["to_rgb"]
    wrgb = modulated_weight(rgbp["conv_w"], rgbp["mod_w"], rgbp["mod_b"],
                            latent[:, 1 + num_convs], demodulate=False)  # (B, 3, C)

    if use_pallas:
        # Fold the sqrt(2) activation gain of the *previous* layer's
        # fused_leaky_relu into every weight whose input is an activation.
        w1_k = w1.astype(mxu_dtype)
        wc_k = (wc * SQRT2).astype(mxu_dtype)
        wrgb_k = (wrgb * SQRT2).astype(mxu_dtype)
        b1 = c1["act_b"][:, None].astype(jnp.float32)                       # (C, 1)
        bc = jnp.stack([cv["act_b"] for cv in params["convs"]])[:, :, None] # (L, C, 1)
        brgb = rgbp["bias"][:, None].astype(jnp.float32)                    # (3, 1)
        grid_t = jnp.transpose(grid, (0, 2, 1)).astype(jnp.float32)         # (B, d, N)
        b2 = (2.0 * math.pi * params["fourier_B"]).T.astype(jnp.float32)    # (F/2, d)
        out_b3n = styled_chain_pallas(grid_t, b2, w1_k, wc_k, wrgb_k,
                                      b1, bc.astype(jnp.float32), brgb, tn=tn)
    else:
        # pure-JAX f32 reference with the original (unfolded) semantics
        ff = fourier_mapping(grid.reshape(B * N, in_dim), params["fourier_B"])
        ff = ff.reshape(B, N, -1).astype(jnp.float32)
        h = jnp.einsum("bnf,bcf->bnc", ff, w1)
        h = _lrelu_scaled(h + c1["act_b"][None, None, :])
        for l, cv in enumerate(params["convs"]):
            h = jnp.einsum("bnc,bdc->bnd", h, wc[:, l])
            h = _lrelu_scaled(h + cv["act_b"][None, None, :])
        rgb = jnp.einsum("bnc,brc->bnr", h, wrgb) + rgbp["bias"][None, None, :]
        out_b3n = jnp.transpose(rgb, (0, 2, 1))
    # skip is torch.zeros((B,3,1,N)) added inside ToRGB -> no-op.

    # PyTorch output layout (B, 3, 1, N): pure reshape, no transpose needed.
    result = out_b3n[:, :, None, :]
    return result, latent


# ----------------------------------------------------------------------------
if __name__ == "__main__":
    STYLE_DIM = 32
    N_MLP = 2
    NUM_CHANNELS = 32
    NUM_LAYERS = 3          # -> 2 body convs + final ToRGB, n_latent = 4
    FOURIER_OUT = 16
    B, N, GRID_DIM = 2, 1024, 2
    LR_MLP = 0.01

    key = jax.random.PRNGKey(0)
    kp, kg, ks = jax.random.split(key, 3)
    params = init_params(kp, style_dim=STYLE_DIM, n_mlp=N_MLP,
                         num_channels=NUM_CHANNELS, num_layers=NUM_LAYERS,
                         fourier_out=FOURIER_OUT, grid_dim=GRID_DIM,
                         lr_mlp=LR_MLP)

    grid = jax.random.uniform(kg, (B, N, GRID_DIM), minval=-1.0, maxval=1.0)
    style_z = jax.random.normal(ks, (B, STYLE_DIM))

    out, latent = inr_generator_forward(grid, style_z, params, use_pallas=True)
    out = jax.block_until_ready(out)

    # correctness check against a pure-JAX f32 reference (bf16 MXU operands in
    # the kernel -> loosened tolerance).
    ref, _ = inr_generator_forward(grid, style_z, params, use_pallas=False)
    ref = jax.block_until_ready(ref)
    assert out.shape == (B, 3, 1, N), out.shape
    assert latent.shape == (B, NUM_LAYERS + 1, STYLE_DIM), latent.shape
    assert jnp.allclose(out, ref, rtol=5e-2, atol=5e-2), \
        float(jnp.max(jnp.abs(out - ref)))

    print("KERNEL_OK")
</pallas_src>

<mosaic_0001>
module attributes {stable_mosaic.version = 11 : i64} {
  func.func @inr_chain_kernel(%arg0: i32, %arg1: i32, %arg2: memref<1x2x512xf32, #tpu.memory_space<vmem>>, %arg3: memref<8x2xf32, #tpu.memory_space<vmem>>, %arg4: memref<1x32x16xbf16, #tpu.memory_space<vmem>>, %arg5: memref<1x2x32x32xbf16, #tpu.memory_space<vmem>>, %arg6: memref<1x3x32xbf16, #tpu.memory_space<vmem>>, %arg7: memref<32x1xf32, #tpu.memory_space<vmem>>, %arg8: memref<2x32x1xf32, #tpu.memory_space<vmem>>, %arg9: memref<3x1xf32, #tpu.memory_space<vmem>>, %arg10: memref<1x3x512xf32, #tpu.memory_space<vmem>>) attributes {dimension_semantics = [#tpu.dimension_semantics<parallel>, #tpu.dimension_semantics<parallel>], iteration_bounds = array<i64: 2, 2>, scalar_prefetch = 0 : i64, scratch_operands = 0 : i64, tpu.core_type = #tpu.core_type<tc>, window_params = [{transform_indices = @transform_0, window_bounds = array<i64: 1, 2, 512>}, {pipeline_mode = #tpu.pipeline_mode<synchronous>, transform_indices = @transform_1, window_bounds = array<i64: 8, 2>}, {transform_indices = @transform_2, window_bounds = array<i64: 1, 32, 16>}, {transform_indices = @transform_3, window_bounds = array<i64: 1, 2, 32, 32>}, {transform_indices = @transform_4, window_bounds = array<i64: 1, 3, 32>}, {pipeline_mode = #tpu.pipeline_mode<synchronous>, transform_indices = @transform_5, window_bounds = array<i64: 32, 1>}, {pipeline_mode = #tpu.pipeline_mode<synchronous>, transform_indices = @transform_6, window_bounds = array<i64: 2, 32, 1>}, {pipeline_mode = #tpu.pipeline_mode<synchronous>, transform_indices = @transform_7, window_bounds = array<i64: 3, 1>}, {transform_indices = @transform_8, window_bounds = array<i64: 1, 3, 512>}]} {
    %c0 = arith.constant 0 : index
    %c0_0 = arith.constant 0 : index
    %c0_1 = arith.constant 0 : index
    %0 = vector.load %arg2[%c0, %c0_0, %c0_1] : memref<1x2x512xf32, #tpu.memory_space<vmem>>, vector<1x2x512xf32>
    %1 = vector.shape_cast %0 : vector<1x2x512xf32> to vector<2x512xf32>
    %c0_2 = arith.constant 0 : index
    %c0_3 = arith.constant 0 : index
    %2 = vector.load %arg3[%c0_2, %c0_3] : memref<8x2xf32, #tpu.memory_space<vmem>>, vector<8x2xf32>
    %3 = vector.extract_strided_slice %2 {offsets = [0, 0], sizes = [8, 1], strides = [1, 1]} : vector<8x2xf32> to vector<8x1xf32>
    %4 = vector.extract_strided_slice %1 {offsets = [0, 0], sizes = [1, 512], strides = [1, 1]} : vector<2x512xf32> to vector<1x512xf32>
    %5 = vector.broadcast %3 : vector<8x1xf32> to vector<8x512xf32>
    %6 = vector.broadcast %4 : vector<1x512xf32> to vector<8x512xf32>
    %7 = arith.mulf %5, %6 : vector<8x512xf32>
    %8 = vector.extract_strided_slice %2 {offsets = [0, 1], sizes = [8, 1], strides = [1, 1]} : vector<8x2xf32> to vector<8x1xf32>
    %9 = vector.extract_strided_slice %1 {offsets = [1, 0], sizes = [1, 512], strides = [1, 1]} : vector<2x512xf32> to vector<1x512xf32>
    %10 = vector.broadcast %8 : vector<8x1xf32> to vector<8x512xf32>
    %11 = vector.broadcast %9 : vector<1x512xf32> to vector<8x512xf32>
    %12 = arith.mulf %10, %11 : vector<8x512xf32>
    %13 = arith.addf %7, %12 : vector<8x512xf32>
    %14 = math.sin %13 : vector<8x512xf32>
    %15 = math.cos %13 : vector<8x512xf32>
    %16 = tpu.concatenate %14, %15 in 0 : vector<8x512xf32>, vector<8x512xf32> -> vector<16x512xf32>
    %c0_4 = arith.constant 0 : index
    %c0_5 = arith.constant 0 : index
    %c0_6 = arith.constant 0 : index
    %17 = vector.load %arg4[%c0_4, %c0_5, %c0_6] : memref<1x32x16xbf16, #tpu.memory_space<vmem>>, vector<1x32x16xbf16>
    %18 = vector.shape_cast %17 : vector<1x32x16xbf16> to vector<32x16xbf16>
    %19 = arith.truncf %16 : vector<16x512xf32> to vector<16x512xbf16>
    %cst = arith.constant dense<0.000000e+00> : vector<32x512xf32>
    %20 = tpu.matmul %18, %19, %cst {dimension_numbers = #tpu.dot_dimension_numbers<[1], [0], [0], [1], [0, 0, 1, 1], [], []>} : vector<32x16xbf16>, vector<16x512xbf16>, vector<32x512xf32> -> vector<32x512xf32>
    %c0_7 = arith.constant 0 : index
    %c0_8 = arith.constant 0 : index
    %21 = vector.load %arg7[%c0_7, %c0_8] : memref<32x1xf32, #tpu.memory_space<vmem>>, vector<32x1xf32>
    %22 = vector.broadcast %21 : vector<32x1xf32> to vector<32x512xf32>
    %23 = arith.addf %20, %22 : vector<32x512xf32>
    %cst_9 = arith.constant 0.000000e+00 : f32
    %24 = vector.broadcast %cst_9 : f32 to vector<32x512xf32>
    %25 = arith.cmpf oge, %23, %24 : vector<32x512xf32>
    %cst_10 = arith.constant 2.000000e-01 : f32
    %26 = vector.broadcast %cst_10 : f32 to vector<32x512xf32>
    %27 = arith.mulf %26, %23 : vector<32x512xf32>
    %28 = arith.select %25, %23, %27 : vector<32x512xi1>, vector<32x512xf32>
    %c0_11 = arith.constant 0 : index
    %c0_12 = arith.constant 0 : index
    %c0_13 = arith.constant 0 : index
    %c0_14 = arith.constant 0 : index
    %29 = vector.load %arg5[%c0_11, %c0_12, %c0_13, %c0_14] : memref<1x2x32x32xbf16, #tpu.memory_space<vmem>>, vector<1x1x32x32xbf16>
    %30 = vector.shape_cast %29 : vector<1x1x32x32xbf16> to vector<32x32xbf16>
    %31 = arith.truncf %28 : vector<32x512xf32> to vector<32x512xbf16>
    %cst_15 = arith.constant dense<0.000000e+00> : vector<32x512xf32>
    %32 = tpu.matmul %30, %31, %cst_15 {dimension_numbers = #tpu.dot_dimension_numbers<[1], [0], [0], [1], [0, 0, 1, 1], [], []>} : vector<32x32xbf16>, vector<32x512xbf16>, vector<32x512xf32> -> vector<32x512xf32>
    %c0_16 = arith.constant 0 : index
    %c0_17 = arith.constant 0 : index
    %c0_18 = arith.constant 0 : index
    %33 = vector.load %arg8[%c0_16, %c0_17, %c0_18] : memref<2x32x1xf32, #tpu.memory_space<vmem>>, vector<1x32x1xf32>
    %34 = vector.shape_cast %33 : vector<1x32x1xf32> to vector<32x1xf32>
    %35 = vector.broadcast %34 : vector<32x1xf32> to vector<32x512xf32>
    %36 = arith.addf %32, %35 : vector<32x512xf32>
    %cst_19 = arith.constant 0.000000e+00 : f32
    %37 = vector.broadcast %cst_19 : f32 to vector<32x512xf32>
    %38 = arith.cmpf oge, %36, %37 : vector<32x512xf32>
    %cst_20 = arith.constant 2.000000e-01 : f32
    %39 = vector.broadcast %cst_20 : f32 to vector<32x512xf32>
    %40 = arith.mulf %39, %36 : vector<32x512xf32>
    %41 = arith.select %38, %36, %40 : vector<32x512xi1>, vector<32x512xf32>
    %c0_21 = arith.constant 0 : index
    %c1 = arith.constant 1 : index
    %c0_22 = arith.constant 0 : index
    %c0_23 = arith.constant 0 : index
    %42 = vector.load %arg5[%c0_21, %c1, %c0_22, %c0_23] : memref<1x2x32x32xbf16, #tpu.memory_space<vmem>>, vector<1x1x32x32xbf16>
    %43 = vector.shape_cast %42 : vector<1x1x32x32xbf16> to vector<32x32xbf16>
    %44 = arith.truncf %41 : vector<32x512xf32> to vector<32x512xbf16>
    %cst_24 = arith.constant dense<0.000000e+00> : vector<32x512xf32>
    %45 = tpu.matmul %43, %44, %cst_24 {dimension_numbers = #tpu.dot_dimension_numbers<[1], [0], [0], [1], [0, 0, 1, 1], [], []>} : vector<32x32xbf16>, vector<32x512xbf16>, vector<32x512xf32> -> vector<32x512xf32>
    %c1_25 = arith.constant 1 : index
    %c0_26 = arith.constant 0 : index
    %c0_27 = arith.constant 0 : index
    %46 = vector.load %arg8[%c1_25, %c0_26, %c0_27] : memref<2x32x1xf32, #tpu.memory_space<vmem>>, vector<1x32x1xf32>
    %47 = vector.shape_cast %46 : vector<1x32x1xf32> to vector<32x1xf32>
    %48 = vector.broadcast %47 : vector<32x1xf32> to vector<32x512xf32>
    %49 = arith.addf %45, %48 : vector<32x512xf32>
    %cst_28 = arith.constant 0.000000e+00 : f32
    %50 = vector.broadcast %cst_28 : f32 to vector<32x512xf32>
    %51 = arith.cmpf oge, %49, %50 : vector<32x512xf32>
    %cst_29 = arith.constant 2.000000e-01 : f32
    %52 = vector.broadcast %cst_29 : f32 to vector<32x512xf32>
    %53 = arith.mulf %52, %49 : vector<32x512xf32>
    %54 = arith.select %51, %49, %53 : vector<32x512xi1>, vector<32x512xf32>
    %c0_30 = arith.constant 0 : index
    %c0_31 = arith.constant 0 : index
    %c0_32 = arith.constant 0 : index
    %55 = vector.load %arg6[%c0_30, %c0_31, %c0_32] : memref<1x3x32xbf16, #tpu.memory_space<vmem>>, vector<1x3x32xbf16>
    %56 = vector.shape_cast %55 : vector<1x3x32xbf16> to vector<3x32xbf16>
    %57 = arith.truncf %54 : vector<32x512xf32> to vector<32x512xbf16>
    %cst_33 = arith.constant dense<0.000000e+00> : vector<3x512xf32>
    %58 = tpu.matmul %56, %57, %cst_33 {dimension_numbers = #tpu.dot_dimension_numbers<[1], [0], [0], [1], [0, 0, 1, 1], [], []>} : vector<3x32xbf16>, vector<32x512xbf16>, vector<3x512xf32> -> vector<3x512xf32>
    %c0_34 = arith.constant 0 : index
    %c0_35 = arith.constant 0 : index
    %59 = vector.load %arg9[%c0_34, %c0_35] : memref<3x1xf32, #tpu.memory_space<vmem>>, vector<3x1xf32>
    %60 = vector.broadcast %59 : vector<3x1xf32> to vector<3x512xf32>
    %61 = arith.addf %58, %60 : vector<3x512xf32>
    %c0_36 = arith.constant 0 : index
    %c0_37 = arith.constant 0 : index
    %c0_38 = arith.constant 0 : index
    %62 = vector.load %arg10[%c0_36, %c0_37, %c0_38] : memref<1x3x512xf32, #tpu.memory_space<vmem>>, vector<1x3x512xf32>
    %63 = vector.shape_cast %62 : vector<1x3x512xf32> to vector<3x512xf32>
    %64 = vector.shape_cast %61 : vector<3x512xf32> to vector<1x3x512xf32>
    tpu.vector_store %arg10[%c0_36, %c0_37, %c0_38], %64 {strides = array<i32>} : memref<1x3x512xf32, #tpu.memory_space<vmem>>, vector<1x3x512xf32>,
    return
  }
  func.func @transform_0(%arg0: i32, %arg1: i32) -> (i32, i32, i32) {
    %c0_i32 = arith.constant 0 : i32
    %c0_i32_0 = arith.constant 0 : i32
    return %arg0, %c0_i32, %arg1 : i32, i32, i32
  }
  func.func @transform_1(%arg0: i32, %arg1: i32) -> (i32, i32) {
    %c0_i32 = arith.constant 0 : i32
    %c0_i32_0 = arith.constant 0 : i32
    %c0_i32_1 = arith.constant 0 : i32
    return %c0_i32, %c0_i32_0 : i32, i32
  }
  func.func @transform_2(%arg0: i32, %arg1: i32) -> (i32, i32, i32) {
    %c0_i32 = arith.constant 0 : i32
    %c0_i32_0 = arith.constant 0 : i32
    %c0_i32_1 = arith.constant 0 : i32
    return %arg0, %c0_i32, %c0_i32_0 : i32, i32, i32
  }
  func.func @transform_3(%arg0: i32, %arg1: i32) -> (i32, i32, i32, i32) {
    %c0_i32 = arith.constant 0 : i32
    %c0_i32_0 = arith.constant 0 : i32
    %c0_i32_1 = arith.constant 0 : i32
    %c0_i32_2 = arith.constant 0 : i32
    return %arg0, %c0_i32, %c0_i32_0, %c0_i32_1 : i32, i32, i32, i32
  }
  func.func @transform_4(%arg0: i32, %arg1: i32) -> (i32, i32, i32) {
    %c0_i32 = arith.constant 0 : i32
    %c0_i32_0 = arith.constant 0 : i32
    %c0_i32_1 = arith.constant 0 : i32
    return %arg0, %c0_i32, %c0_i32_0 : i32, i32, i32
  }
  func.func @transform_5(%arg0: i32, %arg1: i32) -> (i32, i32) {
    %c0_i32 = arith.constant 0 : i32
    %c0_i32_0 = arith.constant 0 : i32
    %c0_i32_1 = arith.constant 0 : i32
    return %c0_i32, %c0_i32_0 : i32, i32
  }
  func.func @transform_6(%arg0: i32, %arg1: i32) -> (i32, i32, i32) {
    %c0_i32 = arith.constant 0 : i32
    %c0_i32_0 = arith.constant 0 : i32
    %c0_i32_1 = arith.constant 0 : i32
    %c0_i32_2 = arith.constant 0 : i32
    return %c0_i32, %c0_i32_0, %c0_i32_1 : i32, i32, i32
  }
  func.func @transform_7(%arg0: i32, %arg1: i32) -> (i32, i32) {
    %c0_i32 = arith.constant 0 : i32
    %c0_i32_0 = arith.constant 0 : i32
    %c0_i32_1 = arith.constant 0 : i32
    return %c0_i32, %c0_i32_0 : i32, i32
  }
  func.func @transform_8(%arg0: i32, %arg1: i32) -> (i32, i32, i32) {
    %c0_i32 = arith.constant 0 : i32
    %c0_i32_0 = arith.constant 0 : i32
    return %arg0, %c0_i32, %arg1 : i32, i32, i32
  }
}

</mosaic_0001>

<bundles_post_ra>
// kernel: tpu_custom_call.1
= control target key start
LH: loop header
LB: loop body
LE: loop exit
PB: predicated region body
PF: predicated region fallthrough
CT: control target
= control target key end

     0   :  { %s2444_s27 = smov 0   ;;  %s2446_s28 = smov 0   ;;  %s2987_s0 = inlined_call_operand.vmem [shape: f32[2,2,1024], index: 0, kind: input, shape index: {}]   ;;  %s2988_s1 = inlined_call_operand.vmem [shape: f32[8,2], index: 1, kind: input, shape index: {}]   ;;  %s2989_s2 = inlined_call_operand.vmem [shape: bf16[2,32,16], index: 2, kind: input, shape index: {}]   ;;  %s2990_s3 = inlined_call_operand.vmem [shape: bf16[2,2,32,32], index: 3, kind: input, shape index: {}]   ;;  %s2991_s4 = inlined_call_operand.vmem [shape: bf16[2,3,32], index: 4, kind: input, shape index: {}]   ;;  %s2992_s5 = inlined_call_operand.vmem [shape: f32[32,1], index: 5, kind: input, shape index: {}]   ;;  %s2993_s6 = inlined_call_operand.vmem [shape: f32[2,32,1], index: 6, kind: input, shape index: {}]   ;;  %s2994_s7 = inlined_call_operand.vmem [shape: f32[3,1], index: 7, kind: input, shape index: {}]   ;;  %s2995_s8 = inlined_call_operand.vmem [shape: f32[2,3,1024], index: 8, kind: output, shape index: {}]  }
   0x1   :  { %s2448_s29 = smov 0   ;;  %s2450_s30 = smov 0  }
   0x2   :  { %s2452_s9 = smov 0  }
   0x3 LB: > { %s27_s10 = sadd.s32 1, %s2381_s29  ;;  %s30_s11 = sadd.s32 1, %s2385_s30  ;;  %s2389_s9 = sphi %s2452_s9, %s18_s9   ;;  %s2385_s30 = sphi %s2450_s30, %s3003_s30   ;;  %s2381_s29 = sphi %s2448_s29, %s3002_s29   ;;  %s2377_s28 = sphi %s2446_s28, %s3001_s28   ;;  %s2373_s27 = sphi %s2444_s27, %s3000_s27  }
   0x4   : > { %p28_p0 = scmp.ge.s32.totalorder %s27_s10, 2  ;;  %p2185_p1 = scmp.ge.s32.totalorder %s2389_s9, 1 }
   0x5   : > { %p312_p2 = scmp.lt.s32.totalorder %s2389_s9, 5 }
   0x6   : > { %s3005_s10 = smov (%p28_p0, %s27_s10), 0  ;;  %s3007_s11 = smov (!%p28_p0, %s30_s11), %s2385_s30 }
   0x7   : > { %p313_p3 = pnand %p2185_p1, %p312_p2  ;;  %p32_p4 = scmp.ge.s32.totalorder %s3007_s11, 2 }
   0x8   : > { %s2186_s14 = sshll.u32 (!%p313_p3), %s2373_s27, 2  ;;  %p369_p5 = scmp.lt.s32.totalorder (!%p313_p3), %s2377_s28, 1 }
   0x9   : > { %s3009_s11 = smov (%p32_p4, %s3007_s11), 0  ;;  %316 = sbr.rel (%p313_p3) target bundleno = 1162 (0x48a), region = 52 }
   0xa   : > { %p371_p6 = scmp.lt.s32.totalorder (!%p313_p3), %s2186_s14, 7 }
   0xe   : > { %v404_v0 = vld [vmem:[%s2988_s1] sm:$0xff]  ;;  %v411_v1 = vlaneseq  ;;  %v2391_v2 = vmov 0   ;;  %s3011_s28 = smov (!%p369_p5, %s2377_s28), 1  ;;  %s3013_s14 = smov (!%p371_p6, %s2186_s14), 7  ;;  %v2392_v5 = vmov 1  }
   0xf   : > { %2325 = vset.pattern.permute.xlu0 %v2391_v2  ;;  %1408 = vmatprep.mubr.bf16.mxu0 %v2391_v2  ;;  %s2187_s15 = sshll.u32 %s3011_s28, 3  ;;  %s2259_s21 = sshll.u32 %s3011_s28, 4 }
  0x10   : > { %407 = vperm.xlu0 %2325, %v404_v0   ;;  %v412_v3 = vshrl.u32 %v411_v1, 7  ;;  %1461 = vmatprep.mubr.bf16.mxu1 %v2391_v2  ;;  %s2484_s16 = sadd.s32 %s2187_s15, %s3013_s14  ;;  %s2549_s24 = scalar_lea.vmem %s2989_s2, %s2259_s21 }
  0x11   : > { %2327 = vset.pattern.permute.xlu1 %v2391_v2  ;;  %s2188_s17 = sshll.u32 %s2484_s16, 1  ;;  %s2193_s26 = sshll.u32 %s3011_s28, 1 }
  0x12   : > { %v421_v4 = vsub.s32 4, %v412_v3  ;;  %v465_v6 = vsub.s32 5, %v412_v3  ;;  %s376_s20 = scalar_lea.vmem %s2987_s0, %s2188_s17  ;;  %v413_v8 = vsub.s32 0, %v412_v3  ;;  %v457_v10 = vsub.s32 1, %v412_v3  ;;  %s391_s13 = scalar_lea.vmem %s2991_s4, %s2193_s26 }
  0x13   : > { %v403_v7 = vld [vmem:[%s376_s20] sm:$0xff]  ;;  %v417_v14 = vsub.s32 2, %v412_v3  ;;  %v425_v15 = vsub.s32 6, %v412_v3  ;;  %v461_v16 = vsub.s32 3, %v412_v3  ;;  %v469_v17 = vsub.s32 7, %v412_v3 }
  0x14   : > { %2326 = vset.pattern.permute.xlu0 %v2392_v5  ;;  %v422_v9 = vrot.slane %v403_v7, %v421_v4  ;;  %v466_v11 = vrot.slane %v403_v7, %v465_v6  ;;  %v414_v18 = vrot.slane %v403_v7, %v413_v8  ;;  %v458_v21 = vrot.slane %v403_v7, %v457_v10 }
  0x15   : > { %452 = vperm.xlu0 %2326, %v404_v0   ;;  %v418_v19 = vrot.slane %v403_v7, %v417_v14  ;;  %v426_v20 = vrot.slane %v403_v7, %v425_v15  ;;  %v462_v22 = vrot.slane %v403_v7, %v461_v16  ;;  %v470_v23 = vrot.slane %v403_v7, %v469_v17 }
  0x16   : > { %v442_v12 = vrot.slane %v422_v9, %v413_v8  ;;  %v486_v13 = vrot.slane %v466_v11, %v457_v10  ;;  %v434_v25 = vrot.slane %v414_v18, %v413_v8  ;;  %v478_v29 = vrot.slane %v458_v21, %v457_v10 }
  0x17   : > { %v438_v26 = vrot.slane %v418_v19, %v413_v8  ;;  %v446_v27 = vrot.slane %v426_v20, %v413_v8  ;;  %v482_v30 = vrot.slane %v462_v22, %v457_v10  ;;  %v490_v31 = vrot.slane %v470_v23, %v457_v10 }
  0x18   : > { %v2394_v14 = vmov 2475754826   ;;  %v2395_v17 = vmov 2131351028   ;;  %v2396_v20 = vmov 2102212464  }
  0x19   : > { %2328 = vset.pattern.permute.xlu0 %v2391_v2  ;;  %v2397_v23 = vmov 920167782  }
  0x8b   : > { %v408_v24 = vpop.permute.xlu0 %407 }
  0x8c   : > { %v449_v28 = vmul.f32 %v442_v12, %v408_v24  ;;  %v447_v32 = vmul.f32 %v434_v25, %v408_v24  ;;  %v448_v33 = vmul.f32 %v438_v26, %v408_v24  ;;  %v450_v34 = vmul.f32 %v446_v27, %v408_v24 }
  0x8d   : > { %v2393_v12 = vmov 683565275   ;;  %v2398_v26 = vmov 1326507024  }
  0x90   : > { %v453_v35 = vpop.permute.xlu0 %452 }
  0x91   : > { %v491_v36 = vmul.f32 %v478_v29, %v453_v35  ;;  %v492_v37 = vmul.f32 %v482_v30, %v453_v35  ;;  %v493_v38 = vmul.f32 %v486_v13, %v453_v35  ;;  %v494_v39 = vmul.f32 %v490_v31, %v453_v35 }
  0x93   : > { %v2491_v40 = vadd.f32 %v491_v36, %v447_v32  ;;  %v2493_v41 = vadd.f32 %v492_v37, %v448_v33  ;;  %v2495_v42 = vadd.f32 %v493_v38, %v449_v28  ;;  %v2497_v43 = vadd.f32 %v494_v39, %v450_v34 }
  0x95   : > { %v502_v44 = vand.u32 2139095040, %v2491_v40  ;;  %v606_v45 = vand.u32 2139095040, %v2493_v41  ;;  %v710_v46 = vand.u32 2139095040, %v2495_v42  ;;  %v814_v47 = vand.u32 2139095040, %v2497_v43 }
  0x96   : > { %v603_v48 = vand.u32 2147483647, %v2493_v41  ;;  %v811_v57 = vand.u32 2147483647, %v2497_v43  ;;  %vm605_vm14 = vcmp.lt.s32.totalorder %v2493_v41, 0 }
  0x97   : > { %v503_v49 = vshrl.u32 %v502_v44, 23  ;;  %v607_v50 = vshrl.u32 %v606_v45, 23  ;;  %v815_v51 = vshrl.u32 %v814_v47, 23  ;;  %v711_v52 = vshrl.u32 %v710_v46, 23 }
  0x98   : > { %v610_v53 = vand.u32 8388607, %v603_v48  ;;  %v2509_v63 = vand.u32 8388607, %v811_v57  ;;  %vm2633_vm15 = vcmp.le.f32.partialorder %v603_v48, 0.7853982 }
  0x99   : > { %v2197_v54 = vadd.s32 4294967169, %v503_v49  ;;  %v2201_v55 = vadd.s32 4294967169, %v607_v50  ;;  %v2209_v56 = vadd.s32 4294967169, %v815_v51  ;;  %v2205_v61 = vadd.s32 4294967169, %v711_v52 }
  0x9a   : > { %v611_v62 = vor.u32 8388608, %v610_v53  ;;  %v819_v9 = vor.u32 8388608, %v2509_v63 }
  0x9b   : > { %v509_v58 = vadd.s32 1, %v2197_v54  ;;  %v613_v59 = vadd.s32 1, %v2201_v55  ;;  %v821_v60 = vadd.s32 1, %v2209_v56  ;;  %v2511_v4 = vadd.s32 1, %v2205_v61 }
  0x9c   : > { %v2513_v5 = vshll.u32 %v611_v62, 8 }
  0x9d   : > { %vm614_vm0 = vcmp.gt.s32.totalorder %v613_v59, 0  ;;  %vm822_vm1 = vcmp.gt.s32.totalorder %v821_v60, 0  ;;  %vm510_vm2 = vcmp.gt.s32.totalorder %v509_v58, 0  ;;  %vm718_vm12 = vcmp.gt.s32.totalorder %v2511_v4, 0 }
  0x9e   : > { %v615_v0 = vsel %vm614_vm0, %v613_v59, 0  ;;  %v823_v1 = vsel %vm822_vm1, %v821_v60, 0  ;;  %v2515_v6 = vsel %vm510_vm2, %v509_v58, 0 }
  0x9f   : > { %v617_v3 = vand.u32 31, %v615_v0  ;;  %v825_v8 = vand.u32 31, %v823_v1  ;;  %v616_v10 = vshrl.u32 %v615_v0, 5  ;;  %v2518_v11 = vshrl.u32 %v823_v1, 5 }
  0xa1   : > { %v618_v7 = vsub.s32 32, %v617_v3  ;;  %v620_v13 = vshll.u32 %v2393_v12, %v617_v3  ;;  %v623_v15 = vshll.u32 %v2394_v14, %v617_v3  ;;  %v626_v19 = vshll.u32 %v2395_v17, %v617_v3 }
  0xa2   : > { %v629_v22 = vshll.u32 %v2396_v20, %v617_v3  ;;  %v632_v25 = vshll.u32 %v2397_v23, %v617_v3  ;;  %v826_v28 = vsub.s32 32, %v825_v8  ;;  %vm635_vm3 = vcmp.lt.s32.totalorder %v616_v10, 1 }
  0xa3   : > { %v621_v16 = vshrl.u32 %v2394_v14, %v618_v7  ;;  %v624_v18 = vshrl.u32 %v2395_v17, %v618_v7  ;;  %v627_v21 = vshrl.u32 %v2396_v20, %v618_v7  ;;  %v630_v24 = vshrl.u32 %v2397_v23, %v618_v7 }
  0xa4   : > { %v633_v27 = vshrl.u32 %v2398_v26, %v618_v7  ;;  %vm638_vm4 = vcmp.lt.s32.totalorder %v616_v10, 4  ;;  %v619_v34 = vshrl.u32 %v2393_v12, %v618_v7  ;;  %vm636_vm5 = vcmp.lt.s32.totalorder %v616_v10, 2 }
  0xa5   : > { %v622_v29 = vor.u32 %v621_v16, %v620_v13  ;;  %v625_v30 = vor.u32 %v624_v18, %v623_v15  ;;  %v628_v31 = vor.u32 %v627_v21, %v626_v19  ;;  %v631_v32 = vor.u32 %v630_v24, %v629_v22 }
  0xa6   : > { %v634_v33 = vor.u32 %v633_v27, %v632_v25  ;;  %vm637_vm6 = vcmp.lt.s32.totalorder %v616_v10, 3  ;;  %v828_v51 = vshll.u32 %v2393_v12, %v825_v8  ;;  %v829_v52 = vshrl.u32 %v2394_v14, %v826_v28 }
  0xa7   : > { %v640_v35 = vsel %vm638_vm4, %v628_v31, 2102212464  ;;  %v643_v36 = vsel %vm635_vm3, %v622_v29, %v625_v30  ;;  %v647_v37 = vsel %vm635_vm3, %v625_v30, %v628_v31  ;;  %v644_v38 = vsel %vm638_vm4, %v631_v32, 920167782 }
  0xa8   : > { %v648_v39 = vsel %vm638_vm4, %v634_v33, 1326507024  ;;  %v639_v44 = vsel %vm635_vm3, %v619_v34, %v622_v29  ;;  %v641_v45 = vsel %vm637_vm6, %v625_v30, %v640_v35  ;;  %v645_v46 = vsel %vm637_vm6, %v628_v31, %v644_v38 }
  0xa9   : > { %v649_v47 = vsel %vm637_vm6, %v631_v32, %v648_v39  ;;  %v646_v49 = vsel %vm636_vm5, %v643_v36, %v645_v46  ;;  %v642_v58 = vsel %vm636_vm5, %v639_v44, %v641_v45  ;;  %v827_v59 = vshrl.u32 %v2393_v12, %v826_v28 }
  0xaa   : > { %v650_v50 = vsel %vm636_vm5, %v647_v37, %v649_v47  ;;  %v2538_v55 = vmul.u32.u64.low %v2513_v5, %v646_v49  ;;  %v2539_v56 = vmul.u32.u64.high %v2513_v5, %v646_v49, %v2538_v55  ;;  %v831_v60 = vshll.u32 %v2394_v14, %v825_v8 }
  0xab   : > { %v2534_v53 = vmul.u32.u64.low %v2513_v5, %v650_v50  ;;  %v2535_v54 = vmul.u32.u64.high %v2513_v5, %v650_v50, %v2534_v53  ;;  %v832_v61 = vshrl.u32 %v2395_v17, %v826_v28  ;;  %v830_v62 = vor.u32 %v829_v52, %v828_v51  ;;  %v1338_v50 = vld [vmem:[%s2992_s5 + $0x18] sm:$0xff]  ;;  %v1336_v51 = vld [vmem:[%s2992_s5 + $0x8] sm:$0xff] }
  0xac   : > { %v834_v0 = vshll.u32 %v2395_v17, %v825_v8  ;;  %v835_v1 = vshrl.u32 %v2396_v20, %v826_v28  ;;  %v838_v3 = vshrl.u32 %v2397_v23, %v826_v28  ;;  %v837_v10 = vshll.u32 %v2396_v20, %v825_v8  ;;  %1346 = vperm.xlu0 %2328, %v1336_v51  }
  0xad   : > { %v833_v7 = vor.u32 %v832_v61, %v831_v60  ;;  %v840_v13 = vshll.u32 %v2397_v23, %v825_v8  ;;  %v841_v15 = vshrl.u32 %v2398_v26, %v826_v28  ;;  %v658_v16 = vmul.u32 %v2513_v5, %v642_v58 }
  0xae   : > { %vm660_vm7 = vc.u32 %v2535_v54, %v2538_v55  ;;  %v661_v18 = vadd.s32 1, %v2539_v56  ;;  %v836_v19 = vor.u32 %v835_v1, %v834_v0  ;;  %v839_v21 = vor.u32 %v838_v3, %v837_v10  ;;  %v1335_v1 = vld [vmem:[%s2992_s5] sm:$0xff] }
  0xaf   : > { %v842_v22 = vor.u32 %v841_v15, %v840_v13  ;;  %vm843_vm8 = vcmp.lt.s32.totalorder %v2518_v11, 1  ;;  %vm846_vm9 = vcmp.lt.s32.totalorder %v2518_v11, 4  ;;  %vm844_vm10 = vcmp.lt.s32.totalorder %v2518_v11, 2 }
  0xb0   : > { %v662_v24 = vsel %vm660_vm7, %v661_v18, %v2539_v56  ;;  %v848_v8 = vsel %vm846_vm9, %v836_v19, 2102212464  ;;  %v851_v25 = vsel %vm843_vm8, %v830_v62, %v833_v7  ;;  %vm845_vm11 = vcmp.lt.s32.totalorder %v2518_v11, 3 }
  0xb1   : > { %v663_v27 = vadd.s32 %v662_v24, %v658_v16  ;;  %v852_v5 = vsel %vm846_vm9, %v839_v21, 920167782  ;;  %v855_v28 = vsel %vm843_vm8, %v833_v7, %v836_v19  ;;  %v847_v29 = vsel %vm843_vm8, %v827_v59, %v830_v62  ;;  %v1542_v59 = vld [vmem:[%s2993_s6] sm:$0xff] }
  0xb2   : > { %v853_v30 = vsel %vm845_vm11, %v836_v19, %v852_v5  ;;  %v856_v31 = vsel %vm846_vm9, %v842_v22, 1326507024  ;;  %v859_v32 = vshll.u32 %v819_v9, 8  ;;  %v849_v34 = vsel %vm845_vm11, %v833_v7, %v848_v8  ;;  %v1337_v9 = vld [vmem:[%s2992_s5 + $0x10] sm:$0xff]  ;;  %1548 = vperm.xlu0 %2328, %v1542_v59  }
  0xb3   : > { %v664_v33 = vadd.s32 536870912, %v663_v27  ;;  %v854_v35 = vsel %vm844_vm10, %v851_v25, %v853_v30  ;;  %v857_v36 = vsel %vm845_vm11, %v839_v21, %v856_v31  ;;  %v513_v37 = vand.u32 31, %v2515_v6  ;;  %1351 = vperm.xlu1 %2327, %v1337_v9  }
  0xb4   : > { %v858_v38 = vsel %vm844_vm10, %v855_v28, %v857_v36  ;;  %v2573_v39 = vmul.u32.u64.low %v859_v32, %v854_v35  ;;  %v2574_v44 = vmul.u32.u64.high %v859_v32, %v854_v35, %v2573_v39  ;;  %v850_v47 = vsel %vm844_vm10, %v847_v29, %v849_v34  ;;  %v1544_v29 = vld [vmem:[%s2993_s6 + $0x10] sm:$0xff]  ;;  %v2245_v36 = vld [vmem:[%s2993_s6 + $0x20] sm:$0xff] }
  0xb5   : > { %v2577_v45 = vshrl.u32 %v664_v33, 30  ;;  %v2579_v46 = vmul.u32.u64.low %v859_v32, %v858_v38  ;;  %v2580_v63 = vmul.u32.u64.high %v859_v32, %v858_v38, %v2579_v46  ;;  %v514_v52 = vsub.s32 32, %v513_v37 }
  0xb6   : > { %v869_v53 = vadd.s32 1, %v2574_v44  ;;  %v866_v11 = vmul.u32 %v859_v32, %v850_v47  ;;  %v499_v58 = vand.u32 2147483647, %v2491_v40  ;;  %v2606_v61 = vsel %vm718_vm12, %v2511_v4, 0 }
  0xb7   : > { %v666_v49 = vshll.u32 %v2577_v45, 30  ;;  %vm868_vm13 = vc.u32 %v2580_v63, %v2573_v39  ;;  %1356 = vperm.xlu1 %2327, %v1338_v50   ;;  %v2614_v3 = vshrl.u32 %v2515_v6, 5  ;;  %v517_v7 = vshrl.u32 %v2394_v14, %v514_v52  ;;  %v2247_v6 = vld [vmem:[%s2993_s6 + $0x30] sm:$0xff] }
  0xb8   : > { %v870_v60 = vsel %vm868_vm13, %v869_v53, %v2574_v44  ;;  %v525_v10 = vshll.u32 %v2396_v20, %v513_v37  ;;  %v526_v13 = vshrl.u32 %v2397_v23, %v514_v52  ;;  %v2622_v15 = vand.u32 8388607, %v499_v58  ;;  %1767 = vperm.xlu0 %2328, %v2247_v6  }
  0xb9   : > { %v2596_v56 = vsub.s32 %v663_v27, %v666_v49  ;;  %v871_v0 = vadd.s32 %v870_v60, %v866_v11  ;;  %v520_v16 = vshrl.u32 %v2395_v17, %v514_v52  ;;  %v523_v18 = vshrl.u32 %v2396_v20, %v514_v52  ;;  %v1954_v11 = vld [vmem:[%s2994_s7] sm:$0x7] }
  0xba   : > { %v516_v21 = vshll.u32 %v2393_v12, %v513_v37  ;;  %v527_v22 = vor.u32 %v526_v13, %v525_v10  ;;  %v529_v24 = vshrl.u32 %v2398_v26, %v514_v52  ;;  %v689_v27 = vsub.s32 4, %v2577_v45  ;;  %v1543_v13 = vld [vmem:[%s2993_s6 + $0x8] sm:$0xff] }
  0xbb   : > { %v669_v62 = vsub.s32 0, %v2596_v56  ;;  %v872_v19 = vadd.s32 536870912, %v871_v0  ;;  %1341 = vperm.xlu1 %2327, %v1335_v1   ;;  %v519_v5 = vshll.u32 %v2394_v14, %v513_v37  ;;  %v522_v28 = vshll.u32 %v2395_v17, %v513_v37 }
  0xbc   : > { %v2644_v30 = vand.u32 31, %v2606_v61  ;;  %v518_v48 = vor.u32 %v517_v7, %v516_v21  ;;  %v528_v32 = vshll.u32 %v2397_v23, %v513_v37  ;;  %vm534_vm0 = vcmp.lt.s32.totalorder %v2614_v3, 4  ;;  %1757 = vperm.xlu0 %2328, %v2245_v36  }
  0xbd   : > { %v2202_v4 = vmin.u32 %v669_v62, %v2596_v56  ;;  %v2646_v31 = vshrl.u32 %v872_v19, 30  ;;  %v521_v34 = vor.u32 %v520_v16, %v519_v5  ;;  %v524_v35 = vor.u32 %v523_v18, %v522_v28 }
  0xbe   : > { %v659_v38 = vadd.s32 %v2538_v55, %v2535_v54  ;;  %v530_v46 = vor.u32 %v529_v24, %v528_v32  ;;  %v540_v9 = vsel %vm534_vm0, %v527_v22, 920167782  ;;  %v690_v37 = vsel %vm605_vm14, %v689_v27, %v2577_v45  ;;  %v1545_v54 = vld [vmem:[%s2993_s6 + $0x18] sm:$0xff] }
  0xbf   : > { %v671_v25 = vclz %v2202_v4  ;;  %v874_v44 = vshll.u32 %v2646_v31, 30  ;;  %1558 = vperm.xlu1 %2327, %v1544_v29   ;;  %v507_v47 = vor.u32 8388608, %v2622_v15  ;;  %v515_v49 = vshrl.u32 %v2393_v12, %v514_v52  ;;  %v2248_v29 = vld [vmem:[%s2993_s6 + $0x38] sm:$0xff] }
  0xc0   : > { %vm531_vm2 = vcmp.lt.s32.totalorder %v2614_v3, 1  ;;  %vm533_vm3 = vcmp.lt.s32.totalorder %v2614_v3, 3  ;;  %vm532_vm4 = vcmp.lt.s32.totalorder %v2614_v3, 2  ;;  %v544_v62 = vsel %vm534_vm0, %v530_v46, 1326507024  ;;  %1957 = vperm.xlu0 %2328, %v1954_v11  }
  0xc1   : > { %v2203_v33 = vadd.s32 4294967294, %v671_v25  ;;  %v2666_v50 = vsub.s32 %v871_v0, %v874_v44  ;;  %v539_v45 = vsel %vm531_vm2, %v518_v48, %v521_v34  ;;  %v541_v52 = vsel %vm533_vm3, %v524_v35, %v540_v9 }
  0xc2   : > { %v543_v60 = vsel %vm531_vm2, %v521_v34, %v524_v35  ;;  %v545_v10 = vsel %vm533_vm3, %v527_v22, %v544_v62  ;;  %v692_v4 = vsel %vm2633_vm15, 0, %v690_v37  ;;  %v536_v16 = vsel %vm534_vm0, %v524_v35, 2102212464 }
  0xc3   : > { %vm2204_vm1 = vcmp.lt.s32.totalorder %v2203_v33, 0  ;;  %v877_v59 = vsub.s32 0, %v2666_v50  ;;  %1563 = vperm.xlu1 %2327, %v1545_v54   ;;  %v546_v19 = vsel %vm532_vm4, %v543_v60, %v545_v10  ;;  %v547_v21 = vshll.u32 %v507_v47, 8 }
  0xc4   : > { %v674_v55 = vsel %vm2204_vm1, 0, %v2203_v33  ;;  %v535_v24 = vsel %vm531_vm2, %v515_v49, %v518_v48  ;;  %v537_v27 = vsel %vm533_vm3, %v521_v34, %v536_v16  ;;  %v696_v32 = vadd.s32 3, %v692_v4 }
  0xc5   : > { %v675_v51 = vsub.s32 32, %v674_v55  ;;  %v679_v53 = vsub.s32 4294967266, %v674_v55  ;;  %v676_v0 = vshll.u32 %v2596_v56, %v674_v55  ;;  %v2210_v15 = vmin.u32 %v877_v59, %v2666_v50 }
  0xc6   : > { %v542_v56 = vsel %vm532_vm4, %v539_v45, %v541_v52  ;;  %v2702_v5 = vmul.u32.u64.low %v547_v21, %v546_v19  ;;  %v2703_v28 = vmul.u32.u64.high %v547_v21, %v546_v19, %v2702_v5  ;;  %v722_v48 = vsub.s32 32, %v2644_v30 }
  0xc7   : > { %v677_v1 = vshrl.u32 %v659_v38, %v675_v51  ;;  %v680_v7 = vadd.s32 127, %v679_v53  ;;  %v879_v22 = vclz %v2210_v15  ;;  %1553 = vperm.xlu1 %2327, %v1543_v13   ;;  %v2714_v46 = vshrl.u32 %v2606_v61, 5  ;;  %v2246_v61 = vld [vmem:[%s2993_s6 + $0x28] sm:$0xff] }
  0xc8   : > { %v2708_v35 = vmul.u32.u64.low %v547_v21, %v542_v56  ;;  %v2709_v36 = vmul.u32.u64.high %v547_v21, %v542_v56, %v2708_v35  ;;  %v867_v34 = vadd.s32 %v2573_v39, %v2580_v63  ;;  %v538_v9 = vsel %vm532_vm4, %v535_v24, %v537_v27 }
  0xc9   : > { %v678_v18 = vor.u32 %v677_v1, %v676_v0  ;;  %v681_v6 = vshll.u32 %v680_v7, 23  ;;  %v2211_v33 = vadd.s32 4294967294, %v879_v22  ;;  %v2720_v47 = vand.u32 3, %v692_v4 }
  0xca   : > { %vm556_vm6 = vc.u32 %v2703_v28, %v2708_v35  ;;  %v2727_v54 = vand.u32 3, %v696_v32  ;;  %v557_v63 = vadd.s32 1, %v2709_v36  ;;  %v554_v51 = vmul.u32 %v547_v21, %v538_v9 }
  0xcb   : > { %v682_v25 = vor.u32 4788187, %v681_v6  ;;  %v685_v44 = vcvt.s32.f32 %v678_v18  ;;  %vm2212_vm5 = vcmp.lt.s32.totalorder %v2211_v33, 0  ;;  %1772 = vperm.xlu1 %2327, %v2248_v29   ;;  %v707_v53 = vand.u32 2147483647, %v2495_v42 }
  0xcc   : > { %v882_v49 = vsel %vm2212_vm5, 0, %v2211_v33  ;;  %v725_v45 = vshrl.u32 %v2394_v14, %v722_v48  ;;  %v558_v60 = vsel %vm556_vm6, %v557_v63, %v2709_v36  ;;  %v724_v1 = vshll.u32 %v2393_v12, %v2644_v30 }
  0xcd   : > { %v683_v38 = vand.u32 2147483647, %v682_v25  ;;  %v883_v55 = vsub.s32 32, %v882_v49  ;;  %v887_v39 = vsub.s32 4294967266, %v882_v49  ;;  %v884_v52 = vshll.u32 %v2666_v50, %v882_v49 }
  0xce   : > { %v559_v0 = vadd.s32 %v558_v60, %v554_v51  ;;  %v728_v7 = vshrl.u32 %v2395_v17, %v722_v48  ;;  %v727_v4 = vshll.u32 %v2394_v14, %v2644_v30  ;;  %v730_v16 = vshll.u32 %v2395_v17, %v2644_v30 }
  0xcf   : > { %v686_v37 = vmul.f32 %v685_v44, %v683_v38  ;;  %v885_v11 = vshrl.u32 %v867_v34, %v883_v55  ;;  %v888_v59 = vadd.s32 127, %v887_v39  ;;  %1762 = vperm.xlu1 %2327, %v2246_v61   ;;  %v731_v56 = vshrl.u32 %v2396_v20, %v722_v48 }
  0xd0   : > { %v560_v15 = vadd.s32 536870912, %v559_v0  ;;  %v897_v6 = vsub.s32 4, %v2646_v31  ;;  %v726_v19 = vor.u32 %v725_v45, %v724_v1  ;;  %v723_v8 = vshrl.u32 %v2393_v12, %v722_v48 }
  0xd1   : > { %v687_v3 = vxor.u32 2147483648, %v686_v37  ;;  %v886_v13 = vor.u32 %v885_v11, %v884_v52  ;;  %v889_v50 = vshll.u32 %v888_v59, 23  ;;  %v729_v22 = vor.u32 %v728_v7, %v727_v4 }
  0xd2   : > { %v2748_v21 = vshrl.u32 %v560_v15, 30  ;;  %v732_v24 = vor.u32 %v731_v56, %v730_v16  ;;  %v734_v27 = vshrl.u32 %v2397_v23, %v722_v48  ;;  %v737_v5 = vshrl.u32 %v2398_v26, %v722_v48 }
  0xd3   : > { %v688_v62 = vsel %vm605_vm14, %v687_v3, %v686_v37  ;;  %v890_v18 = vor.u32 4788187, %v889_v50  ;;  %v893_v14 = vcvt.s32.f32 %v886_v13  ;;  %v714_v29 = vand.u32 8388607, %v707_v53 }
  0xd4   : > { %v691_v10 = vsel %vm2633_vm15, %v2493_v41, %v688_v62  ;;  %v562_v17 = vshll.u32 %v2748_v21, 30  ;;  %v736_v32 = vshll.u32 %v2397_v23, %v2644_v30  ;;  %vm739_vm7 = vcmp.lt.s32.totalorder %v2714_v46, 1 }
  0xd5   : > { %2335 = vcosq.f32 %v691_v10  ;;  %v891_v25 = vand.u32 2147483647, %v890_v18  ;;  %v733_v12 = vshll.u32 %v2396_v20, %v2644_v30  ;;  %vm742_vm8 = vcmp.lt.s32.totalorder %v2714_v46, 4 }
  0xd6   : > { %2337 = vsinq.f32 %v691_v10  ;;  %v743_v36 = vsel %vm739_vm7, %v723_v8, %v726_v19  ;;  %v2764_v26 = vsub.s32 %v559_v0, %v562_v17  ;;  %v738_v48 = vor.u32 %v737_v5, %v736_v32 }
  0xd7   : > { %v894_v33 = vmul.f32 %v893_v14, %v891_v25  ;;  %vm741_vm9 = vcmp.lt.s32.totalorder %v2714_v46, 3  ;;  %v744_v38 = vsel %vm742_vm8, %v732_v24, 2102212464  ;;  %v735_v44 = vor.u32 %v734_v27, %v733_v12 }
  0xd8   : > { %vm740_vm10 = vcmp.lt.s32.totalorder %v2714_v46, 2  ;;  %v745_v20 = vsel %vm741_vm9, %v729_v22, %v744_v38  ;;  %vm2774_vm11 = vcmp.le.f32.partialorder %v811_v57, 0.7853982  ;;  %vm813_vm12 = vcmp.lt.s32.totalorder %v2497_v43, 0 }
  0xd9   : > { %v895_v23 = vxor.u32 2147483648, %v894_v33  ;;  %v565_v34 = vsub.s32 0, %v2764_v26  ;;  %v2782_v9 = vsel %vm740_vm10, %v743_v36, %v745_v20  ;;  %vm1112_vm13 = vcmp.lt.s32.totalorder %v2720_v47, 2 }
  0xda   : > { %vm1113_vm14 = vcmp.eq.s32.totalorder %v2720_v47, 0  ;;  %v898_v49 = vsel %vm813_vm12, %v897_v6, %v2646_v31  ;;  %v715_v61 = vor.u32 8388608, %v714_v29  ;;  %vm695_vm15 = vweird.f32 %v2493_v41 }
  0xdb   : > { %v896_v37 = vsel %vm813_vm12, %v895_v23, %v894_v33  ;;  %vm1116_vm0 = vcmp.eq.s32.totalorder %v2720_v47, 2  ;;  %v2198_v55 = vmin.u32 %v565_v34, %v2764_v26  ;;  %v752_v39 = vsel %vm742_vm8, %v738_v48, 1326507024 }
  0xdc   : > { %v899_v57 = vsel %vm2774_vm11, %v2497_v43, %v896_v37  ;;  %vm698_vm1 = vcmp.lt.s32.totalorder %v2727_v54, 2  ;;  %v748_v31 = vsel %vm742_vm8, %v735_v44, 920167782  ;;  %v751_v63 = vsel %vm739_vm7, %v729_v22, %v732_v24 }
  0xdd   : > { %2339 = vcosq.f32 %v899_v57  ;;  %vm699_vm2 = vcmp.eq.s32.totalorder %v2727_v54, 0  ;;  %v900_v3 = vsel %vm2774_vm11, 0, %v898_v49  ;;  %v567_v51 = vclz %v2198_v55 }
  0xde   : > { %2341 = vsinq.f32 %v899_v57  ;;  %vm702_vm3 = vcmp.eq.s32.totalorder %v2727_v54, 2  ;;  %v747_v52 = vsel %vm739_vm7, %v726_v19, %v729_v22  ;;  %v753_v11 = vsel %vm741_vm9, %v735_v44, %v752_v39 }
  0xdf   : > { %v755_v59 = vshll.u32 %v715_v61, 8  ;;  %v2199_v0 = vadd.s32 4294967294, %v567_v51  ;;  %v749_v1 = vsel %vm741_vm9, %v732_v24, %v748_v31  ;;  %v754_v7 = vsel %vm740_vm10, %v751_v63, %v753_v11 }
  0xe0   : > { %v904_v13 = vadd.s32 3, %v900_v3  ;;  %v1317_v56 = vand.u32 3, %v900_v3  ;;  %v750_v8 = vsel %vm740_vm10, %v747_v52, %v749_v1  ;;  %v555_v25 = vadd.s32 %v2708_v35, %v2703_v28 }
  0xe1   : > { %v2812_v50 = vmul.u32.u64.low %v755_v59, %v754_v7  ;;  %v2813_v4 = vmul.u32.u64.high %v755_v59, %v754_v7, %v2812_v50  ;;  %vm2200_vm4 = vcmp.lt.s32.totalorder %v2199_v0, 0  ;;  %vm903_vm6 = vweird.f32 %v2497_v43 }
  0xe2   : > { %v2336_v45 = vpop.eup %2335  ;;  %v570_v19 = vsel %vm2200_vm4, 0, %v2199_v0  ;;  %v2834_v54 = vmul.u32.u64.low %v755_v59, %v750_v8  ;;  %v2835_v33 = vmul.u32.u64.high %v755_v59, %v750_v8, %v2834_v54  ;;  %v905_v47 = vand.u32 3, %v904_v13 }
  0xe3   : > { %v2338_v60 = vpop.eup %2337  ;;  %v703_v62 = vxor.u32 2147483648, %v2336_v45  ;;  %v571_v14 = vsub.s32 32, %v570_v19  ;;  %v572_v17 = vshll.u32 %v2764_v26, %v570_v19  ;;  %v575_v46 = vsub.s32 4294967266, %v570_v19 }
  0xe4   : > { %v700_v10 = vxor.u32 2147483648, %v2338_v60  ;;  %v763_v28 = vadd.s32 %v2834_v54, %v2813_v4  ;;  %vm764_vm5 = vc.u32 %v2813_v4, %v2834_v54  ;;  %vm1319_vm7 = vcmp.eq.s32.totalorder %v1317_v56, 0 }
  0xe5   : > { %v704_v15 = vsel %vm702_vm3, %v703_v62, %v2338_v60  ;;  %v1118_v16 = vsel %vm1116_vm0, %v703_v62, %v2338_v60  ;;  %v573_v32 = vshrl.u32 %v555_v25, %v571_v14  ;;  %v576_v12 = vadd.s32 127, %v575_v46 }
  0xe6   : > { %v701_v18 = vsel %vm699_vm2, %v2336_v45, %v700_v10  ;;  %v1115_v6 = vsel %vm1113_vm14, %v2336_v45, %v700_v10  ;;  %vm1322_vm8 = vcmp.eq.s32.totalorder %v1317_v56, 2  ;;  %v765_v41 = vadd.s32 1, %v2835_v33 }
  0xe7   : > { %v705_v22 = vsel %vm698_vm1, %v701_v18, %v704_v15  ;;  %v1119_v24 = vsel %vm1112_vm13, %v1115_v6, %v1118_v16  ;;  %v574_v36 = vor.u32 %v573_v32, %v572_v17  ;;  %v577_v35 = vshll.u32 %v576_v12, 23 }
  0xe8   : > { %v706_v27 = vsel %vm695_vm15, nan, %v705_v22  ;;  %v1120_v5 = vsel %vm695_vm15, nan, %v1119_v24  ;;  %vm907_vm9 = vcmp.eq.s32.totalorder %v905_v47, 0  ;;  %v762_v44 = vmul.u32 %v755_v59, %v2782_v9 }
  0xe9   : > { %v1332_v29 = vpack.c.bf16 %v1120_v5, %v706_v27  ;;  %v578_v23 = vor.u32 4788187, %v577_v35  ;;  %vm910_vm10 = vcmp.eq.s32.totalorder %v905_v47, 2  ;;  %v581_v30 = vcvt.s32.f32 %v574_v36 }
  0xea   : > { %v2340_v48 = vpop.eup %2339  ;;  %v766_v34 = vsel %vm764_vm5, %v765_v41, %v2835_v33  ;;  %vm906_vm11 = vcmp.lt.s32.totalorder %v905_v47, 2  ;;  %vm1318_vm12 = vcmp.lt.s32.totalorder %v1317_v56, 2  ;;  %vm501_vm13 = vcmp.lt.s32.totalorder %v2491_v40, 0 }
  0xeb   : > { %1390 = vmatprep.subr.bf16.mxu0 %v1332_v29  ;;  %v2342_v26 = vpop.eup %2341  ;;  %v911_v38 = vxor.u32 2147483648, %v2340_v48  ;;  %v579_v61 = vand.u32 2147483647, %v578_v23  ;;  %v767_v57 = vadd.s32 %v766_v34, %v762_v44  ;;  %v585_v60 = vsub.s32 4, %v2748_v21  ;;  %v2330_v34 = vld [vmem:[%s2549_s24 + $0x8] sm:$0xff]  }
  0xec   : > { %v908_v20 = vxor.u32 2147483648, %v2342_v26  ;;  %vm500_vm14 = vcmp.le.f32.partialorder %v499_v58, 0.7853982 }
  0xed   : > { %v912_v37 = vsel %vm910_vm10, %v911_v38, %v2342_v26  ;;  %v1324_v49 = vsel %vm1322_vm8, %v911_v38, %v2342_v26  ;;  %v582_v3 = vmul.f32 %v581_v30, %v579_v61  ;;  %v768_v51 = vadd.s32 536870912, %v767_v57  ;;  %v2329_v26 = vld [vmem:[%s2549_s24] sm:$0xff]   ;;  %s2260_s24 = sshll.u32 %s3011_s28, 5  ;;  %s2196_s28 = sshll.u32 %s2484_s16, 2 }
  0xee   : > { %v909_v55 = vsel %vm907_vm9, %v2340_v48, %v908_v20  ;;  %v1321_v39 = vsel %vm1319_vm7, %v2340_v48, %v908_v20  ;;  %v586_v7 = vsel %vm501_vm13, %v585_v60, %v2748_v21  ;;  %vm1369_vm7 = vcmask 130048   ;;  %s2880_s25 = scalar_lea.vmem %s2990_s3, %s2260_s24  ;;  %s400_s17 = scalar_lea.vmem %s2995_s8, %s2196_s28 }
  0xef   : > { %v913_v31 = vsel %vm906_vm11, %v909_v55, %v912_v37  ;;  %v1325_v63 = vsel %vm1318_vm12, %v1321_v39, %v1324_v49  ;;  %v583_v11 = vxor.u32 2147483648, %v582_v3  ;;  %v2848_v59 = vshrl.u32 %v768_v51, 30 }
  0xf0   : > { %v914_v9 = vsel %vm903_vm6, nan, %v913_v31  ;;  %v1326_v45 = vsel %vm903_vm6, nan, %v1325_v63  ;;  %v588_v13 = vsel %vm500_vm14, 0, %v586_v7  ;;  %vm591_vm6 = vweird.f32 %v2491_v40 }
  0xf1   : > { %v1334_v52 = vpack.c.bf16 %v1326_v45, %v914_v9  ;;  %v584_v62 = vsel %vm501_vm13, %v583_v11, %v582_v3  ;;  %v770_v0 = vshll.u32 %v2848_v59, 30  ;;  %v592_v15 = vadd.s32 3, %v588_v13 }
  0xf2   : > { %v587_v1 = vsel %vm500_vm14, %v2491_v40, %v584_v62  ;;  %v1008_v56 = vand.u32 3, %v588_v13  ;;  %vm709_vm8 = vcmp.lt.s32.totalorder %v2495_v42, 0  ;;  %v793_v44 = vsub.s32 4, %v2848_v59 }
  0xf3   : > { %1443 = vmatprep.subr.bf16.mxu1 %v1334_v52  ;;  %2343 = vcosq.f32 %v587_v1  ;;  %v771_v43 = vsub.s32 %v767_v57, %v770_v0  ;;  %v593_v18 = vand.u32 3, %v592_v15  ;;  %vm708_vm9 = vcmp.le.f32.partialorder %v707_v53, 0.7853982 }
  0xf4   : > { %2345 = vsinq.f32 %v587_v1  ;;  %vm1010_vm0 = vcmp.eq.s32.totalorder %v1008_v56, 0  ;;  %vm1013_vm3 = vcmp.eq.s32.totalorder %v1008_v56, 2  ;;  %vm1009_vm5 = vcmp.lt.s32.totalorder %v1008_v56, 2 }
  0xf5   : > { %v773_v10 = vsub.s32 0, %v771_v43  ;;  %vm595_vm1 = vcmp.eq.s32.totalorder %v593_v18, 0  ;;  %vm598_vm2 = vcmp.eq.s32.totalorder %v593_v18, 2  ;;  %vm594_vm4 = vcmp.lt.s32.totalorder %v593_v18, 2 }
  0xf6   : > { %v794_v30 = vsel %vm709_vm8, %v793_v44, %v2848_v59 }
  0xf7   : > { %v2206_v50 = vmin.u32 %v773_v10, %v771_v43  ;;  %v796_v37 = vsel %vm708_vm9, 0, %v794_v30 }
  0xf8   : > { %v800_v49 = vadd.s32 3, %v796_v37  ;;  %v1214_v57 = vand.u32 3, %v796_v37 }
  0xf9   : > { %v775_v4 = vclz %v2206_v50 }
  0xfa   : > { %v801_v61 = vand.u32 3, %v800_v49  ;;  %vm1219_vm11 = vcmp.eq.s32.totalorder %v1214_v57, 2  ;;  %vm1216_vm13 = vcmp.eq.s32.totalorder %v1214_v57, 0 }
  0xfb   : > { %v2207_v16 = vadd.s32 4294967294, %v775_v4 }
  0xfc   : > { %vm806_vm10 = vcmp.eq.s32.totalorder %v801_v61, 2  ;;  %vm803_vm12 = vcmp.eq.s32.totalorder %v801_v61, 0  ;;  %vm802_vm14 = vcmp.lt.s32.totalorder %v801_v61, 2 }
  0xfd   : > { %vm2208_vm15 = vcmp.lt.s32.totalorder %v2207_v16, 0 }
  0xfe   : > { %v778_v58 = vsel %vm2208_vm15, 0, %v2207_v16  ;;  %vm1215_vm15 = vcmp.lt.s32.totalorder %v1214_v57, 2 }
  0xff   : > { %v779_v6 = vsub.s32 32, %v778_v58  ;;  %v783_v19 = vsub.s32 4294967266, %v778_v58  ;;  %v780_v25 = vshll.u32 %v771_v43, %v778_v58 }
 0x100   : > { %v2344_v8 = vpop.eup %2343 }
 0x101   : > { %v2346_v22 = vpop.eup %2345  ;;  %v599_v24 = vxor.u32 2147483648, %v2344_v8  ;;  %v781_v14 = vshrl.u32 %v763_v28, %v779_v6  ;;  %v784_v21 = vadd.s32 127, %v783_v19 }
 0x102   : > { %v596_v27 = vxor.u32 2147483648, %v2346_v22 }
 0x103   : > { %v600_v5 = vsel %vm598_vm2, %v599_v24, %v2346_v22  ;;  %v1015_v17 = vsel %vm1013_vm3, %v599_v24, %v2346_v22  ;;  %v782_v46 = vor.u32 %v781_v14, %v780_v25  ;;  %v785_v29 = vshll.u32 %v784_v21, 23 }
 0x104   : > { %v597_v32 = vsel %vm595_vm1, %v2344_v8, %v596_v27  ;;  %v1012_v54 = vsel %vm1010_vm0, %v2344_v8, %v596_v27  ;;  %vm799_vm0 = vweird.f32 %v2495_v42 }
 0x105   : > { %v601_v33 = vsel %vm594_vm4, %v597_v32, %v600_v5  ;;  %v1016_v47 = vsel %vm1009_vm5, %v1012_v54, %v1015_v17  ;;  %v786_v12 = vor.u32 4788187, %v785_v29  ;;  %v789_v41 = vcvt.s32.f32 %v782_v46 }
 0x106   : > { %v602_v36 = vsel %vm591_vm6, nan, %v601_v33  ;;  %v1017_v28 = vsel %vm591_vm6, nan, %v1016_v47 }
 0x107   : > { %v1331_v35 = vpack.c.bf16 %v1017_v28, %v602_v36  ;;  %v787_v48 = vand.u32 2147483647, %v786_v12 }
 0x109   : > { %1391 = vmatpush1.bf16.msra.mxu0 %v1331_v35  ;;  %v790_v38 = vmul.f32 %v789_v41, %v787_v48 }
 0x10b   : > { %v791_v23 = vxor.u32 2147483648, %v790_v38 }
 0x10c   : > { %2231 = vmatmul.mubr.msk.bf16.vlgmr.msra.gmra.mxu0 %vm1369_vm7, %v2329_v26 }
 0x10d   : > { %v792_v40 = vsel %vm709_vm8, %v791_v23, %v790_v38  ;;  %1418 = vmatprep.mubr.bf16.mxu0 %v2391_v2  ;;  %v2331_v23 = vld [vmem:[%s2880_s25] sm:$0xff]  }
 0x10e   : > { %v795_v20 = vsel %vm708_vm9, %v2495_v42, %v792_v40  ;;  %vm1576_vm9 = vcmask 261120  }
 0x10f   : > { %2347 = vcosq.f32 %v795_v20 }
 0x110   : > { %2349 = vsinq.f32 %v795_v20 }
 0x114   : > { %2232 = vmatmul.mubr.msk.bf16.gmra.mxu0 %vm1369_vm7, %v2330_v34 }
 0x115   : > { %1615 = vmatprep.mubr.bf16.mxu0 %v2391_v2 }
 0x11c   : > { %v2348_v55 = vpop.eup %2347 }
 0x11d   : > { %v2350_v53 = vpop.eup %2349  ;;  %v807_v39 = vxor.u32 2147483648, %v2348_v55 }
 0x11e   : > { %v804_v31 = vxor.u32 2147483648, %v2350_v53 }
 0x11f   : > { %v808_v63 = vsel %vm806_vm10, %v807_v39, %v2350_v53  ;;  %v1221_v3 = vsel %vm1219_vm11, %v807_v39, %v2350_v53 }
 0x120   : > { %v805_v51 = vsel %vm803_vm12, %v2348_v55, %v804_v31  ;;  %v1218_v9 = vsel %vm1216_vm13, %v2348_v55, %v804_v31 }
 0x121   : > { %v809_v45 = vsel %vm802_vm14, %v805_v51, %v808_v63  ;;  %v1222_v52 = vsel %vm1215_vm15, %v1218_v9, %v1221_v3 }
 0x122   : > { %v810_v11 = vsel %vm799_vm0, nan, %v809_v45  ;;  %v1223_v59 = vsel %vm799_vm0, nan, %v1222_v52 }
 0x123   : > { %v1333_v60 = vpack.c.bf16 %v1223_v59, %v810_v11 }
 0x125   : > { %1444 = vmatpush1.bf16.msra.mxu1 %v1333_v60 }
 0x127   : > { %v2886_v13 = vpop.permute.xlu0 %1346 }
 0x128   : > { %2233 = vmatmul.mubr.msk.bf16.vlgmr.msra.gmra.mxu1 %vm1369_vm7, %v2329_v26 }
 0x129   : > { %1471 = vmatprep.mubr.bf16.mxu1 %v2391_v2 }
 0x12e   : > { %v2882_v42 = vpop.permute.xlu1 %1351 }
 0x130   : > { %2234 = vmatmul.mubr.msk.bf16.gmra.mxu1 %vm1369_vm7, %v2330_v34  ;;  %v2332_v34 = vld [vmem:[%s2880_s25 + $0x8] sm:$0xff]  }
 0x131   : > { %1668 = vmatprep.mubr.bf16.mxu1 %v2391_v2 }
 0x132   : > { %v2884_v43 = vpop.permute.xlu1 %1356 }
 0x136   : > { %v2890_v16 = vpop.permute.xlu1 %1341 }
 0x1cc   : > { %v1410_v62 = vpop.f32.mrf.mxu0 }
 0x1cd   : > { %v1411_v21 = vadd.f32 %v1410_v62, %v2890_v16 }
 0x1ce   : > { %v1412_v0 = vpop.f32.mrf.mxu0 }
 0x1cf   : > { %v1413_v58 = vadd.f32 %v1412_v0, %v2890_v16  ;;  %v1498_v47 = vmul.f32 0.2, %v1411_v21  ;;  %vm1482_vm8 = vcmp.ge.f32.partialorder %v1411_v21, 0.0 }
 0x1d0   : > { %v1414_v1 = vpop.f32.mrf.mxu0 }
 0x1d1   : > { %v1415_v19 = vadd.f32 %v1414_v1, %v2886_v13  ;;  %v1499_v5 = vmul.f32 0.2, %v1413_v58  ;;  %vm1483_vm6 = vcmp.ge.f32.partialorder %v1413_v58, 0.0  ;;  %v1514_v26 = vsel %vm1482_vm8, %v1411_v21, %v1498_v47 }
 0x1d2   : > { %v1416_v7 = vpop.f32.mrf.mxu0 }
 0x1d3   : > { %v1417_v50 = vadd.f32 %v1416_v7, %v2886_v13  ;;  %v1502_v46 = vmul.f32 0.2, %v1415_v19  ;;  %vm1486_vm7 = vcmp.ge.f32.partialorder %v1415_v19, 0.0  ;;  %v1515_v35 = vsel %vm1483_vm6, %v1413_v58, %v1499_v5 }
 0x1d4   : > { %v1420_v10 = vpop.f32.mrf.mxu0 }
 0x1d5   : > { %v1421_v56 = vadd.f32 %v1420_v10, %v2882_v42  ;;  %v1503_v8 = vmul.f32 0.2, %v1417_v50  ;;  %vm1487_vm2 = vcmp.ge.f32.partialorder %v1417_v50, 0.0  ;;  %v1518_v48 = vsel %vm1486_vm7, %v1415_v19, %v1502_v46  ;;  %v2924_v46 = vpop.permute.xlu0 %1548 }
 0x1d6   : > { %v1422_v4 = vpop.f32.mrf.mxu0  ;;  %v1534_v38 = vpack.c.bf16 %v1518_v48, %v1514_v26 }
 0x1d7   : > { %v1423_v15 = vadd.f32 %v1422_v4, %v2882_v42  ;;  %v1506_v27 = vmul.f32 0.2, %v1421_v56  ;;  %vm1490_vm4 = vcmp.ge.f32.partialorder %v1421_v56, 0.0  ;;  %v1519_v33 = vsel %vm1487_vm2, %v1417_v50, %v1503_v8 }
 0x1d8   : > { %v1424_v18 = vpop.f32.mrf.mxu0  ;;  %v1535_v41 = vpack.c.bf16 %v1519_v33, %v1515_v35 }
 0x1d9   : > { %v1425_v6 = vadd.f32 %v1424_v18, %v2884_v43  ;;  %v1507_v24 = vmul.f32 0.2, %v1423_v15  ;;  %vm1491_vm3 = vcmp.ge.f32.partialorder %v1423_v15, 0.0  ;;  %v1522_v12 = vsel %vm1490_vm4, %v1421_v56, %v1506_v27 }
 0x1da   : > { %v1426_v22 = vpop.f32.mrf.mxu0 }
 0x1db   : > { %vm1494_vm1 = vcmp.ge.f32.partialorder %v1425_v6, 0.0  ;;  %v1510_v25 = vmul.f32 0.2, %v1425_v6  ;;  %v1427_v14 = vadd.f32 %v1426_v22, %v2884_v43  ;;  %v1523_v32 = vsel %vm1491_vm3, %v1423_v15, %v1507_v24 }
 0x1dd   : > { %vm1495_vm5 = vcmp.ge.f32.partialorder %v1427_v14, 0.0  ;;  %v1511_v17 = vmul.f32 0.2, %v1427_v14  ;;  %v1526_v29 = vsel %vm1494_vm1, %v1425_v6, %v1510_v25  ;;  %v2916_v6 = vpop.permute.xlu1 %1558 }
 0x1de   : > { %v1538_v28 = vpack.c.bf16 %v1526_v29, %v1522_v12 }
 0x1df   : > { %v1527_v54 = vsel %vm1495_vm5, %v1427_v14, %v1511_v17 }
 0x1e0   : > { %v1539_v36 = vpack.c.bf16 %v1527_v54, %v1523_v32 }
 0x1e1   : > { %v2918_v22 = vpop.permute.xlu1 %1563 }
 0x1e2   : > { %1595 = vmatprep.subr.bf16.mxu0 %v1539_v36 }
 0x1e3   : > { %1596 = vmatpush1.bf16.msra.mxu0 %v1538_v28 }
 0x1e4   : > { %1597 = vmatprep.subr.bf16.mxu0 %v1535_v41 }
 0x1e5   : > { %v2920_v21 = vpop.permute.xlu1 %1553 }
 0x1e7   : > { %1598 = vmatpush1.bf16.msra.mxu0 %v1534_v38 }
 0x1e8   : > { %v1463_v44 = vpop.f32.mrf.mxu1 }
 0x1e9   : > { %v1464_v11 = vadd.f32 %v1463_v44, %v2890_v16 }
 0x1ea   : > { %v1465_v40 = vpop.f32.mrf.mxu1  ;;  %2237 = vmatmul.mubr.msk.bf16.vlgmr.msra.gmra.mxu0 %vm1576_vm9, %v2331_v23 }
 0x1eb   : > { %1625 = vmatprep.mubr.bf16.mxu0 %v2391_v2  ;;  %v1466_v39 = vadd.f32 %v1465_v40, %v2890_v16  ;;  %vm1484_vm1 = vcmp.ge.f32.partialorder %v1464_v11, 0.0 }
 0x1ec   : > { %v1467_v20 = vpop.f32.mrf.mxu1 }
 0x1ed   : > { %v1468_v63 = vadd.f32 %v1467_v20, %v2886_v13  ;;  %v1501_v60 = vmul.f32 0.2, %v1466_v39  ;;  %vm1485_vm15 = vcmp.ge.f32.partialorder %v1466_v39, 0.0 }
 0x1ee   : > { %v1469_v30 = vpop.f32.mrf.mxu1 }
 0x1ef   : > { %v1470_v49 = vadd.f32 %v1469_v30, %v2886_v13  ;;  %v1504_v62 = vmul.f32 0.2, %v1468_v63  ;;  %vm1488_vm0 = vcmp.ge.f32.partialorder %v1468_v63, 0.0  ;;  %v1500_v13 = vmul.f32 0.2, %v1464_v11 }
 0x1f0   : > { %v1473_v37 = vpop.f32.mrf.mxu1  ;;  %v1517_v15 = vsel %vm1485_vm15, %v1466_v39, %v1501_v60 }
 0x1f1   : > { %v1474_v55 = vadd.f32 %v1473_v37, %v2882_v42  ;;  %v1505_v3 = vmul.f32 0.2, %v1470_v49  ;;  %vm1489_vm11 = vcmp.ge.f32.partialorder %v1470_v49, 0.0  ;;  %v1520_v16 = vsel %vm1488_vm0, %v1468_v63, %v1504_v62 }
 0x1f2   : > { %v1475_v61 = vpop.f32.mrf.mxu1  ;;  %2238 = vmatmul.mubr.msk.bf16.gmra.mxu0 %vm1576_vm9, %v2332_v34  ;;  %v1516_v18 = vsel %vm1484_vm1, %v1464_v11, %v1500_v13  ;;  %v2334_v11 = vld [vmem:[%s2880_s25 + $0x18] sm:$0xff]  }
 0x1f3   : > { %v1476_v57 = vadd.f32 %v1475_v61, %v2882_v42  ;;  %1823 = vmatprep.mubr.bf16.mxu0 %v2391_v2  ;;  %v1508_v59 = vmul.f32 0.2, %v1474_v55  ;;  %vm1492_vm13 = vcmp.ge.f32.partialorder %v1474_v55, 0.0  ;;  %v1521_v10 = vsel %vm1489_vm11, %v1470_v49, %v1505_v3  ;;  %v2333_v3 = vld [vmem:[%s2880_s25 + $0x10] sm:$0xff]  }
 0x1f4   : > { %v1477_v53 = vpop.f32.mrf.mxu1  ;;  %v1537_v56 = vpack.c.bf16 %v1521_v10, %v1517_v15  ;;  %v1536_v58 = vpack.c.bf16 %v1520_v16, %v1516_v18 }
 0x1f5   : > { %v1478_v31 = vadd.f32 %v1477_v53, %v2884_v43  ;;  %v1509_v9 = vmul.f32 0.2, %v1476_v57  ;;  %vm1493_vm12 = vcmp.ge.f32.partialorder %v1476_v57, 0.0  ;;  %v1524_v50 = vsel %vm1492_vm13, %v1474_v55, %v1508_v59 }
 0x1f6   : > { %v1479_v51 = vpop.f32.mrf.mxu1 }
 0x1f7   : > { %vm1496_vm10 = vcmp.ge.f32.partialorder %v1478_v31, 0.0  ;;  %v1512_v45 = vmul.f32 0.2, %v1478_v31  ;;  %v1480_v52 = vadd.f32 %v1479_v51, %v2884_v43  ;;  %v1525_v1 = vsel %vm1493_vm12, %v1476_v57, %v1509_v9 }
 0x1f9   : > { %vm1497_vm14 = vcmp.ge.f32.partialorder %v1480_v52, 0.0  ;;  %v1513_v42 = vmul.f32 0.2, %v1480_v52  ;;  %v1528_v0 = vsel %vm1496_vm10, %v1478_v31, %v1512_v45 }
 0x1fa   : > { %v1540_v43 = vpack.c.bf16 %v1528_v0, %v1524_v50 }
 0x1fb   : > { %v1529_v7 = vsel %vm1497_vm14, %v1480_v52, %v1513_v42 }
 0x1fc   : > { %v1541_v4 = vpack.c.bf16 %v1529_v7, %v1525_v1 }
 0x1fe   : > { %1648 = vmatprep.subr.bf16.mxu1 %v1541_v4 }
 0x1ff   : > { %1649 = vmatpush1.bf16.msra.mxu1 %v1540_v43 }
 0x200   : > { %1650 = vmatprep.subr.bf16.mxu1 %v1537_v56 }
 0x203   : > { %1651 = vmatpush1.bf16.msra.mxu1 %v1536_v58 }
 0x206   : > { %2239 = vmatmul.mubr.msk.bf16.vlgmr.msra.gmra.mxu1 %vm1576_vm9, %v2331_v23 }
 0x207   : > { %1678 = vmatprep.mubr.bf16.mxu1 %v2391_v2 }
 0x20e   : > { %2240 = vmatmul.mubr.msk.bf16.gmra.mxu1 %vm1576_vm9, %v2332_v34 }
 0x20f   : > { %1876 = vmatprep.mubr.bf16.mxu1 %v2391_v2 }
 0x2aa   : > { %v1617_v19 = vpop.f32.mrf.mxu0 }
 0x2ab   : > { %v1618_v41 = vadd.f32 %v1617_v19, %v2924_v46 }
 0x2ac   : > { %v1619_v8 = vpop.f32.mrf.mxu0 }
 0x2ad   : > { %v1620_v54 = vadd.f32 %v1619_v8, %v2924_v46  ;;  %v1705_v37 = vmul.f32 0.2, %v1618_v41  ;;  %vm1689_vm10 = vcmp.ge.f32.partialorder %v1618_v41, 0.0 }
 0x2ae   : > { %v1621_v24 = vpop.f32.mrf.mxu0 }
 0x2af   : > { %v1622_v47 = vadd.f32 %v1621_v24, %v2920_v21  ;;  %v1706_v38 = vmul.f32 0.2, %v1620_v54  ;;  %vm1690_vm7 = vcmp.ge.f32.partialorder %v1620_v54, 0.0  ;;  %v1721_v31 = vsel %vm1689_vm10, %v1618_v41, %v1705_v37 }
 0x2b0   : > { %v1623_v25 = vpop.f32.mrf.mxu0 }
 0x2b1   : > { %v1624_v27 = vadd.f32 %v1623_v25, %v2920_v21  ;;  %v1709_v44 = vmul.f32 0.2, %v1622_v47  ;;  %vm1693_vm8 = vcmp.ge.f32.partialorder %v1622_v47, 0.0  ;;  %v1722_v55 = vsel %vm1690_vm7, %v1620_v54, %v1706_v38 }
 0x2b2   : > { %v1627_v14 = vpop.f32.mrf.mxu0 }
 0x2b3   : > { %v1628_v29 = vadd.f32 %v1627_v14, %v2916_v6  ;;  %v1710_v12 = vmul.f32 0.2, %v1624_v27  ;;  %vm1694_vm3 = vcmp.ge.f32.partialorder %v1624_v27, 0.0  ;;  %v1725_v53 = vsel %vm1693_vm8, %v1622_v47, %v1709_v44 }
 0x2b4   : > { %v1629_v5 = vpop.f32.mrf.mxu0  ;;  %v1742_v63 = vpack.c.bf16 %v1725_v53, %v1721_v31 }
 0x2b5   : > { %v1630_v17 = vadd.f32 %v1629_v5, %v2916_v6  ;;  %v1713_v26 = vmul.f32 0.2, %v1628_v29  ;;  %vm1697_vm5 = vcmp.ge.f32.partialorder %v1628_v29, 0.0  ;;  %v1726_v34 = vsel %vm1694_vm3, %v1624_v27, %v1710_v12  ;;  %v2950_v12 = vpop.permute.xlu1 %1772 }
 0x2b6   : > { %v1631_v32 = vpop.f32.mrf.mxu0  ;;  %v1743_v39 = vpack.c.bf16 %v1726_v34, %v1722_v55 }
 0x2b7   : > { %v1632_v33 = vadd.f32 %v1631_v32, %v2918_v22  ;;  %v1714_v28 = vmul.f32 0.2, %v1630_v17  ;;  %vm1698_vm4 = vcmp.ge.f32.partialorder %v1630_v17, 0.0  ;;  %v1729_v49 = vsel %vm1697_vm5, %v1628_v29, %v1713_v26 }
 0x2b8   : > { %v1633_v36 = vpop.f32.mrf.mxu0 }
 0x2b9   : > { %vm1701_vm2 = vcmp.ge.f32.partialorder %v1632_v33, 0.0  ;;  %v1717_v35 = vmul.f32 0.2, %v1632_v33  ;;  %v1634_v48 = vadd.f32 %v1633_v36, %v2918_v22  ;;  %v1730_v20 = vsel %vm1698_vm4, %v1630_v17, %v1714_v28  ;;  %v1768_v28 = vpop.permute.xlu0 %1767  ;;  %v1763_v41 = vpop.permute.xlu1 %1762 }
 0x2bb   : > { %vm1702_vm6 = vcmp.ge.f32.partialorder %v1634_v48, 0.0  ;;  %v1718_v23 = vmul.f32 0.2, %v1634_v48  ;;  %v1733_v40 = vsel %vm1701_vm2, %v1632_v33, %v1717_v35 }
 0x2bc   : > { %v1746_v57 = vpack.c.bf16 %v1733_v40, %v1729_v49 }
 0x2bd   : > { %v1734_v30 = vsel %vm1702_vm6, %v1634_v48, %v1718_v23  ;;  %v2952_v44 = vpop.permute.xlu0 %1757 }
 0x2be   : > { %v1747_v61 = vpack.c.bf16 %v1734_v30, %v1730_v20 }
 0x2c0   : > { %1803 = vmatprep.subr.bf16.mxu0 %v1747_v61 }
 0x2c1   : > { %1804 = vmatpush1.bf16.msra.mxu0 %v1746_v57 }
 0x2c2   : > { %1805 = vmatprep.subr.bf16.mxu0 %v1743_v39 }
 0x2c5   : > { %1806 = vmatpush1.bf16.msra.mxu0 %v1742_v63 }
 0x2c6   : > { %v1670_v51 = vpop.f32.mrf.mxu1 }
 0x2c7   : > { %v1671_v56 = vadd.f32 %v1670_v51, %v2924_v46 }
 0x2c8   : > { %v1672_v9 = vpop.f32.mrf.mxu1  ;;  %2251 = vmatmul.mubr.msk.bf16.vlgmr.msra.gmra.mxu0 %vm1576_vm9, %v2333_v3 }
 0x2c9   : > { %1833 = vmatprep.mubr.bf16.mxu0 %v2391_v2  ;;  %v1673_v7 = vadd.f32 %v1672_v9, %v2924_v46  ;;  %vm1691_vm2 = vcmp.ge.f32.partialorder %v1671_v56, 0.0 }
 0x2ca   : > { %v1674_v45 = vpop.f32.mrf.mxu1 }
 0x2cb   : > { %v1675_v13 = vadd.f32 %v1674_v45, %v2920_v21  ;;  %v1708_v58 = vmul.f32 0.2, %v1673_v7  ;;  %vm1692_vm0 = vcmp.ge.f32.partialorder %v1673_v7, 0.0 }
 0x2cc   : > { %v1676_v52 = vpop.f32.mrf.mxu1 }
 0x2cd   : > { %v1677_v60 = vadd.f32 %v1676_v52, %v2920_v21  ;;  %v1711_v19 = vmul.f32 0.2, %v1675_v13  ;;  %vm1695_vm1 = vcmp.ge.f32.partialorder %v1675_v13, 0.0  ;;  %v1707_v21 = vmul.f32 0.2, %v1671_v56 }
 0x2ce   : > { %v1680_v59 = vpop.f32.mrf.mxu1  ;;  %v1724_v17 = vsel %vm1692_vm0, %v1673_v7, %v1708_v58 }
 0x2cf   : > { %v1681_v0 = vadd.f32 %v1680_v59, %v2916_v6  ;;  %v1712_v50 = vmul.f32 0.2, %v1677_v60  ;;  %vm1696_vm12 = vcmp.ge.f32.partialorder %v1677_v60, 0.0  ;;  %v1727_v46 = vsel %vm1695_vm1, %v1675_v13, %v1711_v19  ;;  %v1945_v13 = vld [vmem:[%s391_s13] sm:$0x3] }
 0x2d0   : > { %v1682_v42 = vpop.f32.mrf.mxu1  ;;  %2252 = vmatmul.mubr.msk.bf16.gmra.mxu0 %vm1576_vm9, %v2334_v11  ;;  %v1723_v32 = vsel %vm1691_vm2, %v1671_v56, %v1707_v21 }
 0x2d1   : > { %v1683_v62 = vadd.f32 %v1682_v42, %v2916_v6  ;;  %1995 = vmatprep.mubr.bf16.mxu0 %v2391_v2  ;;  %v1715_v18 = vmul.f32 0.2, %v1681_v0  ;;  %vm1699_vm14 = vcmp.ge.f32.partialorder %v1681_v0, 0.0  ;;  %v1728_v14 = vsel %vm1696_vm12, %v1677_v60, %v1712_v50 }
 0x2d2   : > { %v1684_v1 = vpop.f32.mrf.mxu1  ;;  %v1745_v29 = vpack.c.bf16 %v1728_v14, %v1724_v17  ;;  %v1744_v54 = vpack.c.bf16 %v1727_v46, %v1723_v32 }
 0x2d3   : > { %v1685_v10 = vadd.f32 %v1684_v1, %v2918_v22  ;;  %v1716_v43 = vmul.f32 0.2, %v1683_v62  ;;  %vm1700_vm13 = vcmp.ge.f32.partialorder %v1683_v62, 0.0  ;;  %v1731_v27 = vsel %vm1699_vm14, %v1681_v0, %v1715_v18 }
 0x2d4   : > { %v1686_v4 = vpop.f32.mrf.mxu1 }
 0x2d5   : > { %vm1703_vm11 = vcmp.ge.f32.partialorder %v1685_v10, 0.0  ;;  %v1719_v15 = vmul.f32 0.2, %v1685_v10  ;;  %v1687_v16 = vadd.f32 %v1686_v4, %v2918_v22  ;;  %v1732_v24 = vsel %vm1700_vm13, %v1683_v62, %v1716_v43 }
 0x2d7   : > { %vm1704_vm15 = vcmp.ge.f32.partialorder %v1687_v16, 0.0  ;;  %v1720_v6 = vmul.f32 0.2, %v1687_v16  ;;  %v1735_v8 = vsel %vm1703_vm11, %v1685_v10, %v1719_v15 }
 0x2d8   : > { %v1748_v22 = vpack.c.bf16 %v1735_v8, %v1731_v27 }
 0x2d9   : > { %v1736_v25 = vsel %vm1704_vm15, %v1687_v16, %v1720_v6 }
 0x2da   : > { %v1749_v5 = vpack.c.bf16 %v1736_v25, %v1732_v24 }
 0x2dc   : > { %1856 = vmatprep.subr.bf16.mxu1 %v1749_v5 }
 0x2dd   : > { %1857 = vmatpush1.bf16.msra.mxu1 %v1748_v22 }
 0x2de   : > { %1858 = vmatprep.subr.bf16.mxu1 %v1745_v29 }
 0x2e1   : > { %1859 = vmatpush1.bf16.msra.mxu1 %v1744_v54 }
 0x2e4   : > { %2253 = vmatmul.mubr.msk.bf16.vlgmr.msra.gmra.mxu1 %vm1576_vm9, %v2333_v3 }
 0x2e5   : > { %1886 = vmatprep.mubr.bf16.mxu1 %v2391_v2 }
 0x2ec   : > { %2254 = vmatmul.mubr.msk.bf16.gmra.mxu1 %vm1576_vm9, %v2334_v11 }
 0x2ed   : > { %2036 = vmatprep.mubr.bf16.mxu1 %v2391_v2 }
 0x388   : > { %v1825_v33 = vpop.f32.mrf.mxu0 }
 0x389   : > { %v1826_v53 = vadd.f32 %v1825_v33, %v2952_v44 }
 0x38a   : > { %v1827_v47 = vpop.f32.mrf.mxu0 }
 0x38b   : > { %v1828_v30 = vadd.f32 %v1827_v47, %v2952_v44  ;;  %v1913_v11 = vmul.f32 0.2, %v1826_v53  ;;  %vm1897_vm11 = vcmp.ge.f32.partialorder %v1826_v53, 0.0 }
 0x38c   : > { %v1829_v36 = vpop.f32.mrf.mxu0 }
 0x38d   : > { %v1830_v34 = vadd.f32 %v1829_v36, %v1763_v41  ;;  %v1914_v31 = vmul.f32 0.2, %v1828_v30  ;;  %vm1898_vm8 = vcmp.ge.f32.partialorder %v1828_v30, 0.0  ;;  %v1929_v7 = vsel %vm1897_vm11, %v1826_v53, %v1913_v11 }
 0x38e   : > { %v1831_v35 = vpop.f32.mrf.mxu0 }
 0x38f   : > { %v1832_v26 = vadd.f32 %v1831_v35, %v1763_v41  ;;  %v1917_v3 = vmul.f32 0.2, %v1830_v34  ;;  %vm1901_vm10 = vcmp.ge.f32.partialorder %v1830_v34, 0.0  ;;  %v1930_v62 = vsel %vm1898_vm8, %v1828_v30, %v1914_v31  ;;  %v1958_v30 = vpop.permute.xlu0 %1957 }
 0x390   : > { %v1835_v48 = vpop.f32.mrf.mxu0 }
 0x391   : > { %v1836_v40 = vadd.f32 %v1835_v48, %v1768_v28  ;;  %v1918_v37 = vmul.f32 0.2, %v1832_v26  ;;  %vm1902_vm4 = vcmp.ge.f32.partialorder %v1832_v26, 0.0  ;;  %v1933_v0 = vsel %vm1901_vm10, %v1830_v34, %v1917_v3 }
 0x392   : > { %v1837_v38 = vpop.f32.mrf.mxu0  ;;  %v1946_v10 = vpack.c.bf16 %v1933_v0, %v1929_v7 }
 0x393   : > { %v1838_v23 = vadd.f32 %v1837_v38, %v1768_v28  ;;  %v1921_v39 = vmul.f32 0.2, %v1836_v40  ;;  %vm1905_vm6 = vcmp.ge.f32.partialorder %v1836_v40, 0.0  ;;  %v1934_v52 = vsel %vm1902_vm4, %v1832_v26, %v1918_v37 }
 0x394   : > { %v1839_v20 = vpop.f32.mrf.mxu0  ;;  %v1947_v1 = vpack.c.bf16 %v1934_v52, %v1930_v62 }
 0x395   : > { %v1840_v2 = vadd.f32 %v1839_v20, %v2950_v12  ;;  %v1922_v61 = vmul.f32 0.2, %v1838_v23  ;;  %vm1906_vm5 = vcmp.ge.f32.partialorder %v1838_v23, 0.0  ;;  %v1937_v59 = vsel %vm1905_vm6, %v1836_v40, %v1921_v39 }
 0x396   : > { %v1841_v49 = vpop.f32.mrf.mxu0 }
 0x397   : > { %vm1909_vm3 = vcmp.ge.f32.partialorder %v1840_v2, 0.0  ;;  %v1925_v57 = vmul.f32 0.2, %v1840_v2  ;;  %v1842_v55 = vadd.f32 %v1841_v49, %v2950_v12  ;;  %v1938_v9 = vsel %vm1906_vm5, %v1838_v23, %v1922_v61 }
 0x399   : > { %vm1910_vm7 = vcmp.ge.f32.partialorder %v1842_v55, 0.0  ;;  %v1926_v63 = vmul.f32 0.2, %v1842_v55  ;;  %v1941_v51 = vsel %vm1909_vm3, %v1840_v2, %v1925_v57 }
 0x39a   : > { %v1950_v42 = vpack.c.bf16 %v1941_v51, %v1937_v59 }
 0x39b   : > { %v1942_v45 = vsel %vm1910_vm7, %v1842_v55, %v1926_v63 }
 0x39c   : > { %v1951_v60 = vpack.c.bf16 %v1942_v45, %v1938_v9 }
 0x39e   : > { %1975 = vmatprep.subr.bf16.mxu0 %v1951_v60 }
 0x39f   : > { %1976 = vmatpush1.bf16.msra.mxu0 %v1950_v42 }
 0x3a0   : > { %1977 = vmatprep.subr.bf16.mxu0 %v1947_v1 }
 0x3a3   : > { %1978 = vmatpush1.bf16.msra.mxu0 %v1946_v10 }
 0x3a4   : > { %v1878_v50 = vpop.f32.mrf.mxu1 }
 0x3a5   : > { %v1879_v17 = vadd.f32 %v1878_v50, %v2952_v44 }
 0x3a6   : > { %v1880_v4 = vpop.f32.mrf.mxu1  ;;  %2255 = vmatmul.mubr.msk.bf16.vlgmr.msra.gmra.mxu0 %vm1576_vm9, %v1945_v13 }
 0x3a7   : > { %v1881_v8 = vadd.f32 %v1880_v4, %v2952_v44  ;;  %v1915_v35 = vmul.f32 0.2, %v1879_v17  ;;  %vm1899_vm3 = vcmp.ge.f32.partialorder %v1879_v17, 0.0 }
 0x3a8   : > { %v1882_v43 = vpop.f32.mrf.mxu1 }
 0x3a9   : > { %v1883_v25 = vadd.f32 %v1882_v43, %v1763_v41  ;;  %v1916_v29 = vmul.f32 0.2, %v1881_v8  ;;  %vm1900_vm1 = vcmp.ge.f32.partialorder %v1881_v8, 0.0  ;;  %v1931_v44 = vsel %vm1899_vm3, %v1879_v17, %v1915_v35 }
 0x3aa   : > { %v1884_v15 = vpop.f32.mrf.mxu1 }
 0x3ab   : > { %v1885_v56 = vadd.f32 %v1884_v15, %v1763_v41  ;;  %v1919_v54 = vmul.f32 0.2, %v1883_v25  ;;  %vm1903_vm2 = vcmp.ge.f32.partialorder %v1883_v25, 0.0  ;;  %v1932_v26 = vsel %vm1900_vm1, %v1881_v8, %v1916_v29 }
 0x3ac   : > { %v1888_v16 = vpop.f32.mrf.mxu1 }
 0x3ad   : > { %v1889_v6 = vadd.f32 %v1888_v16, %v1768_v28  ;;  %v1920_v14 = vmul.f32 0.2, %v1885_v56  ;;  %vm1904_vm13 = vcmp.ge.f32.partialorder %v1885_v56, 0.0  ;;  %v1935_v38 = vsel %vm1903_vm2, %v1883_v25, %v1919_v54 }
 0x3ae   : > { %v1890_v18 = vpop.f32.mrf.mxu1  ;;  %v1948_v40 = vpack.c.bf16 %v1935_v38, %v1931_v44 }
 0x3af   : > { %v1891_v58 = vadd.f32 %v1890_v18, %v1768_v28  ;;  %v1923_v46 = vmul.f32 0.2, %v1889_v6  ;;  %vm1907_vm15 = vcmp.ge.f32.partialorder %v1889_v6, 0.0  ;;  %v1936_v28 = vsel %vm1904_vm13, %v1885_v56, %v1920_v14 }
 0x3b0   : > { %v1892_v19 = vpop.f32.mrf.mxu1  ;;  %v1949_v23 = vpack.c.bf16 %v1936_v28, %v1932_v26 }
 0x3b1   : > { %v1893_v24 = vadd.f32 %v1892_v19, %v2950_v12  ;;  %v1924_v27 = vmul.f32 0.2, %v1891_v58  ;;  %vm1908_vm14 = vcmp.ge.f32.partialorder %v1891_v58, 0.0  ;;  %v1939_v48 = vsel %vm1907_vm15, %v1889_v6, %v1923_v46 }
 0x3b2   : > { %v1894_v21 = vpop.f32.mrf.mxu1 }
 0x3b3   : > { %vm1911_vm12 = vcmp.ge.f32.partialorder %v1893_v24, 0.0  ;;  %v1927_v5 = vmul.f32 0.2, %v1893_v24  ;;  %v1895_v22 = vadd.f32 %v1894_v21, %v2950_v12  ;;  %v1940_v47 = vsel %vm1908_vm14, %v1891_v58, %v1924_v27 }
 0x3b5   : > { %vm1912_vm0 = vcmp.ge.f32.partialorder %v1895_v22, 0.0  ;;  %v1928_v32 = vmul.f32 0.2, %v1895_v22  ;;  %v1943_v33 = vsel %vm1911_vm12, %v1893_v24, %v1927_v5 }
 0x3b6   : > { %v1952_v41 = vpack.c.bf16 %v1943_v33, %v1939_v48 }
 0x3b7   : > { %v1944_v36 = vsel %vm1912_vm0, %v1895_v22, %v1928_v32 }
 0x3b8   : > { %v1953_v12 = vpack.c.bf16 %v1944_v36, %v1940_v47 }
 0x3ba   : > { %2016 = vmatprep.subr.bf16.mxu1 %v1953_v12 }
 0x3bb   : > { %2017 = vmatpush1.bf16.msra.mxu1 %v1952_v41 }
 0x3bc   : > { %2018 = vmatprep.subr.bf16.mxu1 %v1949_v23 }
 0x3bf   : > { %2019 = vmatpush1.bf16.msra.mxu1 %v1948_v40 }
 0x3c2   : > { %2256 = vmatmul.mubr.msk.bf16.vlgmr.msra.gmra.mxu1 %vm1576_vm9, %v1945_v13 }
 0x466   : > { %v1997_v20 = vpop.f32.mrf.mxu0 }
 0x467   : > { %v1998_v34 = vadd.f32 %v1997_v20, %v1958_v30 }
 0x468   : > { %v1999_v2 = vpop.f32.mrf.mxu0 }
 0x469   : > { %v2000_v37 = vadd.f32 %v1999_v2, %v1958_v30 }
 0x46a   : > { %v2001_v49 = vpop.f32.mrf.mxu0 }
 0x46b   : > { %v2049_v61 = vcombine.low %v1998_v34, %v2000_v37 }
 0x46c   : > { %v2002_v57 = vpop.f32.mrf.mxu0 }
 0x46d   : > { %2053 = vst [vmem:[%s400_s17] sm:$0x77] %v2049_v61 }
 0x482   : > { %v2038_v55 = vpop.f32.mrf.mxu1 }
 0x483   : > { %v2039_v39 = vadd.f32 %v2038_v55, %v1958_v30 }
 0x484   : > { %v2040_v53 = vpop.f32.mrf.mxu1 }
 0x485   : > { %v2041_v31 = vadd.f32 %v2040_v53, %v1958_v30 }
 0x486   : > { %v2042_v63 = vpop.f32.mrf.mxu1 }
 0x487   : > { %v2050_v3 = vcombine.low %v2039_v39, %v2041_v31 }
 0x488   : > { %v2043_v51 = vpop.f32.mrf.mxu1 }
 0x489   : > { %2054 = vst [vmem:[%s400_s17 + $0x8] sm:$0x77] %v2050_v3 }
 0x48a PF: > { %s18_s9 = sadd.s32 1, %s2389_s9   ;;  %s3000_s27 = smov %s2381_s29 }
 0x48b   : > { %p15_p7 = scmp.ge.s32.totalorder %s18_s9, 6   ;;  %s3001_s28 = smov %s2385_s30 }
 0x48c   : > { %s3002_s29 = smov %s3005_s10  ;;  %s3003_s30 = smov %s3009_s11 }
 0x48d   :  { %17 = sbr.rel (!%p15_p7) target bundleno = 3 (0x3), region = 93 }

</bundles_post_ra>
